<compile_context>
chip_gen: v7x
topology: tpu7x:2x2x1
jax: 0.10.0
libtpu: 0.0.40
codegen_flags: <defaults>
</compile_context>

<pallas_src>
import functools

import jax
import jax.numpy as jnp
from jax.experimental import pallas as pl
from jax.experimental.pallas import tpu as pltpu


# --------------------------------------------------------------------------
# Kernel
# --------------------------------------------------------------------------
def sine_lstm_kernel(x_ref, wih1_ref, whh1_ref, b1_ref,
                     w2_ref, b2_ref, wlin_ref, blin_ref,
                     out_ref, *, seq_len, future, hidden):
    H = hidden

    # Hoist loop-invariant loads out of the recurrence (one vld each).
    x = x_ref[...]
    wih1 = wih1_ref[...]          # (1, 4H)   gate order (i, f, o, g)
    whh1 = whh1_ref[...]          # (H, 4H)
    b1 = b1_ref[...]              # (1, 4H)   fused b_ih + b_hh
    w2 = w2_ref[...]              # (2H, 4H)  fused [W_ih2; W_hh2]
    b2 = b2_ref[...]              # (1, 4H)
    wlin = wlin_ref[...]          # (1, H)
    blin = blin_ref[...]          # (1, 1)

    def sigmoid(v):
        # one EUP push (tanh) instead of exp + reciprocal
        return 0.5 * jnp.tanh(0.5 * v) + 0.5

    def split_act(gates):
        # gate layout (i, f, o, g): sigmoid covers a contiguous 3H slice,
        # tanh covers the last H slice -> 2 EUP pushes per cell.
        sig = sigmoid(gates[:, : 3 * H])
        g = jnp.tanh(gates[:, 3 * H:])
        return sig[:, :H], sig[:, H:2 * H], sig[:, 2 * H:3 * H], g

    def step(inp, h1, c1, h2, c2):
        # ---- layer 1 (input_size == 1): broadcast multiply replaces the
        #      degenerate (B,1) x (1,4H) matmul
        gates1 = (inp * wih1
                  + jnp.dot(h1, whh1, preferred_element_type=jnp.float32)
                  + b1)
        i1, f1, o1, g1 = split_act(gates1)
        c1 = f1 * c1 + i1 * g1
        h1 = o1 * jnp.tanh(c1)

        # ---- layer 2: fused [W_ih; W_hh] -> one MXU push with K = 2H
        xh = jnp.concatenate([h1, h2], axis=1)          # (B, 2H)
        gates2 = jnp.dot(xh, w2, preferred_element_type=jnp.float32) + b2
        i2, f2, o2, g2 = split_act(gates2)
        c2 = f2 * c2 + i2 * g2
        h2 = o2 * jnp.tanh(c2)

        # ---- Linear(hidden -> 1): lane reduction on XLU
        out = jnp.sum(h2 * wlin, axis=1, keepdims=True) + blin   # (B, 1)
        return out, h1, c1, h2, c2

    B = x.shape[0]
    zeros = jnp.zeros((B, H), jnp.float32)
    h1 = c1 = h2 = c2 = zeros

    outs = []
    out = None
    # Fully static unroll (8 + 4 steps): state stays in vregs, indices static.
    for t in range(seq_len):
        out, h1, c1, h2, c2 = step(x[:, t:t + 1], h1, c1, h2, c2)
        outs.append(out)
    for _ in range(future):
        out, h1, c1, h2, c2 = step(out, h1, c1, h2, c2)   # feed back prediction (vreg)
        outs.append(out)

    # Single write-once store of all predictions.
    out_ref[...] = jnp.concatenate(outs, axis=1)


# --------------------------------------------------------------------------
# Wrapper
# --------------------------------------------------------------------------
def sine_lstm_forward(x, params, future=0):
    B, T = x.shape
    H = params["wlin"].shape[1]
    kern = functools.partial(sine_lstm_kernel, seq_len=T, future=future, hidden=H)
    vmem = pl.BlockSpec(memory_space=pltpu.MemorySpace.VMEM)
    return pl.pallas_call(
        kern,
        out_shape=jax.ShapeDtypeStruct((B, T + future), jnp.float32),
        in_specs=[vmem] * 8,
        out_specs=vmem,
    )(x, params["wih1"], params["whh1"], params["b1"],
      params["w2"], params["b2"], params["wlin"], params["blin"])


# --------------------------------------------------------------------------
# Parameter construction
# --------------------------------------------------------------------------
def init_params(key, input_size=1, hidden=32):
    """Raw PyTorch-layout params: U(-1/sqrt(H), 1/sqrt(H)), gate order (i,f,g,o)."""
    H = hidden
    bound = 1.0 / float(jnp.sqrt(H))
    keys = jax.random.split(key, 10)

    def u(k, shape):
        return jax.random.uniform(k, shape, jnp.float32, -bound, bound)

    return dict(
        w_ih1=u(keys[0], (4 * H, input_size)),
        w_hh1=u(keys[1], (4 * H, H)),
        b_ih1=u(keys[2], (4 * H,)),
        b_hh1=u(keys[3], (4 * H,)),
        w_ih2=u(keys[4], (4 * H, H)),
        w_hh2=u(keys[5], (4 * H, H)),
        b_ih2=u(keys[6], (4 * H,)),
        b_hh2=u(keys[7], (4 * H,)),
        w_lin=u(keys[8], (1, H)),
        b_lin=u(keys[9], (1,)),
    )


def prepare_params(raw):
    """Kernel layout: transposed, biases fused, gates reordered (i,f,o,g),
    layer-2 matmuls fused into a single (2H, 4H) weight."""
    H = raw["w_hh1"].shape[1]

    def reorder(w):  # gate axis is last, PyTorch order (i, f, g, o) -> (i, f, o, g)
        i, f, g, o = (w[..., 0:H], w[..., H:2 * H],
                      w[..., 2 * H:3 * H], w[..., 3 * H:4 * H])
        return jnp.concatenate([i, f, o, g], axis=-1)

    w2 = jnp.concatenate([raw["w_ih2"].T, raw["w_hh2"].T], axis=0)     # (2H, 4H)
    return dict(
        wih1=reorder(raw["w_ih1"].T),                                  # (1, 4H)
        whh1=reorder(raw["w_hh1"].T),                                  # (H, 4H)
        b1=reorder((raw["b_ih1"] + raw["b_hh1"])[None, :]),            # (1, 4H)
        w2=reorder(w2),                                                # (2H, 4H)
        b2=reorder((raw["b_ih2"] + raw["b_hh2"])[None, :]),            # (1, 4H)
        wlin=raw["w_lin"],                                             # (1, H)
        blin=raw["b_lin"][None, :],                                    # (1, 1)
    )


# --------------------------------------------------------------------------
# Pure-JAX reference (uses the raw PyTorch-layout params / gate order)
# --------------------------------------------------------------------------
def ref_forward(x, raw, future=0):
    B, T = x.shape
    H = raw["w_hh1"].shape[1]
    h1 = c1 = h2 = c2 = jnp.zeros((B, H), jnp.float32)

    def cell(inp, h, c, w_ih, w_hh, b_ih, b_hh):
        g = inp @ w_ih.T + h @ w_hh.T + b_ih + b_hh
        i, f, gg, o = jnp.split(g, 4, axis=1)
        c_new = jax.nn.sigmoid(f) * c + jax.nn.sigmoid(i) * jnp.tanh(gg)
        h_new = jax.nn.sigmoid(o) * jnp.tanh(c_new)
        return h_new, c_new

    outs = []
    out = None
    for t in range(T):
        inp = x[:, t:t + 1]
        h1, c1 = cell(inp, h1, c1, raw["w_ih1"], raw["w_hh1"], raw["b_ih1"], raw["b_hh1"])
        h2, c2 = cell(h1, h2, c2, raw["w_ih2"], raw["w_hh2"], raw["b_ih2"], raw["b_hh2"])
        out = h2 @ raw["w_lin"].T + raw["b_lin"][None, :]
        outs.append(out)
    for _ in range(future):
        h1, c1 = cell(out, h1, c1, raw["w_ih1"], raw["w_hh1"], raw["b_ih1"], raw["b_hh1"])
        h2, c2 = cell(h1, h2, c2, raw["w_ih2"], raw["w_hh2"], raw["b_ih2"], raw["b_hh2"])
        out = h2 @ raw["w_lin"].T + raw["b_lin"][None, :]
        outs.append(out)
    return jnp.concatenate(outs, axis=1)


# --------------------------------------------------------------------------
if __name__ == "__main__":
    B, T, H, FUTURE = 2, 8, 32, 4

    key = jax.random.PRNGKey(0)
    k_x, k_p = jax.random.split(key)

    # synthetic univariate time-series input (batch, seq_len)
    t_grid = jnp.arange(T, dtype=jnp.float32)[None, :]
    phase = jax.random.uniform(k_x, (B, 1), jnp.float32, 0.0, 2.0)
    x = jnp.sin(0.5 * t_grid + phase).astype(jnp.float32)

    raw = init_params(k_p, input_size=1, hidden=H)
    params = prepare_params(raw)

    out = jax.block_until_ready(sine_lstm_forward(x, params, future=FUTURE))
    ref = ref_forward(x, raw, future=FUTURE)

    assert out.shape == (B, T + FUTURE)
    assert jnp.allclose(out, ref, atol=1e-4, rtol=1e-4), (out, ref)

    print("KERNEL_OK")
</pallas_src>

<mosaic_0001>
module attributes {stable_mosaic.version = 11 : i64} {
  func.func @sine_lstm_kernel(%arg0: memref<2x8xf32, #tpu.memory_space<vmem>>, %arg1: memref<1x128xf32, #tpu.memory_space<vmem>>, %arg2: memref<32x128xf32, #tpu.memory_space<vmem>>, %arg3: memref<1x128xf32, #tpu.memory_space<vmem>>, %arg4: memref<64x128xf32, #tpu.memory_space<vmem>>, %arg5: memref<1x128xf32, #tpu.memory_space<vmem>>, %arg6: memref<1x32xf32, #tpu.memory_space<vmem>>, %arg7: memref<1x1xf32, #tpu.memory_space<vmem>>, %arg8: memref<2x12xf32, #tpu.memory_space<vmem>>) attributes {dimension_semantics = [], scalar_prefetch = 0 : i64, scratch_operands = 0 : i64, tpu.core_type = #tpu.core_type<tc>} {
    %c0 = arith.constant 0 : index
    %c0_0 = arith.constant 0 : index
    %0 = vector.load %arg0[%c0, %c0_0] : memref<2x8xf32, #tpu.memory_space<vmem>>, vector<2x8xf32>
    %c0_1 = arith.constant 0 : index
    %c0_2 = arith.constant 0 : index
    %1 = vector.load %arg1[%c0_1, %c0_2] : memref<1x128xf32, #tpu.memory_space<vmem>>, vector<1x128xf32>
    %c0_3 = arith.constant 0 : index
    %c0_4 = arith.constant 0 : index
    %2 = vector.load %arg2[%c0_3, %c0_4] : memref<32x128xf32, #tpu.memory_space<vmem>>, vector<32x128xf32>
    %c0_5 = arith.constant 0 : index
    %c0_6 = arith.constant 0 : index
    %3 = vector.load %arg3[%c0_5, %c0_6] : memref<1x128xf32, #tpu.memory_space<vmem>>, vector<1x128xf32>
    %c0_7 = arith.constant 0 : index
    %c0_8 = arith.constant 0 : index
    %4 = vector.load %arg4[%c0_7, %c0_8] : memref<64x128xf32, #tpu.memory_space<vmem>>, vector<64x128xf32>
    %c0_9 = arith.constant 0 : index
    %c0_10 = arith.constant 0 : index
    %5 = vector.load %arg5[%c0_9, %c0_10] : memref<1x128xf32, #tpu.memory_space<vmem>>, vector<1x128xf32>
    %c0_11 = arith.constant 0 : index
    %c0_12 = arith.constant 0 : index
    %6 = vector.load %arg6[%c0_11, %c0_12] : memref<1x32xf32, #tpu.memory_space<vmem>>, vector<1x32xf32>
    %c0_13 = arith.constant 0 : index
    %c0_14 = arith.constant 0 : index
    %7 = vector.load %arg7[%c0_13, %c0_14] : memref<1x1xf32, #tpu.memory_space<vmem>>, vector<1x1xf32>
    %cst = arith.constant 0.000000e+00 : f32
    %8 = vector.broadcast %cst : f32 to vector<2x32xf32>
    %9 = vector.extract_strided_slice %0 {offsets = [0, 0], sizes = [2, 1], strides = [1, 1]} : vector<2x8xf32> to vector<2x1xf32>
    %10 = vector.broadcast %9 : vector<2x1xf32> to vector<2x128xf32>
    %11 = vector.broadcast %1 : vector<1x128xf32> to vector<2x128xf32>
    %12 = arith.mulf %10, %11 : vector<2x128xf32>
    %cst_15 = arith.constant dense<0.000000e+00> : vector<2x128xf32>
    %13 = tpu.matmul %8, %2, %cst_15 {dimension_numbers = #tpu.dot_dimension_numbers<[1], [0], [0], [1], [0, 0, 1, 1], [], []>} : vector<2x32xf32>, vector<32x128xf32>, vector<2x128xf32> -> vector<2x128xf32>
    %14 = arith.addf %12, %13 : vector<2x128xf32>
    %15 = vector.broadcast %3 : vector<1x128xf32> to vector<2x128xf32>
    %16 = arith.addf %14, %15 : vector<2x128xf32>
    %17 = vector.extract_strided_slice %16 {offsets = [0, 0], sizes = [2, 96], strides = [1, 1]} : vector<2x128xf32> to vector<2x96xf32>
    %cst_16 = arith.constant 5.000000e-01 : f32
    %18 = vector.broadcast %cst_16 : f32 to vector<2x96xf32>
    %19 = arith.mulf %18, %17 : vector<2x96xf32>
    %20 = math.tanh %19 : vector<2x96xf32>
    %cst_17 = arith.constant 5.000000e-01 : f32
    %21 = vector.broadcast %cst_17 : f32 to vector<2x96xf32>
    %22 = arith.mulf %21, %20 : vector<2x96xf32>
    %cst_18 = arith.constant 5.000000e-01 : f32
    %23 = vector.broadcast %cst_18 : f32 to vector<2x96xf32>
    %24 = arith.addf %22, %23 : vector<2x96xf32>
    %25 = vector.extract_strided_slice %16 {offsets = [0, 96], sizes = [2, 32], strides = [1, 1]} : vector<2x128xf32> to vector<2x32xf32>
    %26 = math.tanh %25 : vector<2x32xf32>
    %27 = vector.extract_strided_slice %24 {offsets = [0, 0], sizes = [2, 32], strides = [1, 1]} : vector<2x96xf32> to vector<2x32xf32>
    %28 = vector.extract_strided_slice %24 {offsets = [0, 32], sizes = [2, 32], strides = [1, 1]} : vector<2x96xf32> to vector<2x32xf32>
    %29 = vector.extract_strided_slice %24 {offsets = [0, 64], sizes = [2, 32], strides = [1, 1]} : vector<2x96xf32> to vector<2x32xf32>
    %30 = arith.mulf %28, %8 : vector<2x32xf32>
    %31 = arith.mulf %27, %26 : vector<2x32xf32>
    %32 = arith.addf %30, %31 : vector<2x32xf32>
    %33 = math.tanh %32 : vector<2x32xf32>
    %34 = arith.mulf %29, %33 : vector<2x32xf32>
    %35 = tpu.concatenate %34, %8 in 1 : vector<2x32xf32>, vector<2x32xf32> -> vector<2x64xf32>
    %cst_19 = arith.constant dense<0.000000e+00> : vector<2x128xf32>
    %36 = tpu.matmul %35, %4, %cst_19 {dimension_numbers = #tpu.dot_dimension_numbers<[1], [0], [0], [1], [0, 0, 1, 1], [], []>} : vector<2x64xf32>, vector<64x128xf32>, vector<2x128xf32> -> vector<2x128xf32>
    %37 = vector.broadcast %5 : vector<1x128xf32> to vector<2x128xf32>
    %38 = arith.addf %36, %37 : vector<2x128xf32>
    %39 = vector.extract_strided_slice %38 {offsets = [0, 0], sizes = [2, 96], strides = [1, 1]} : vector<2x128xf32> to vector<2x96xf32>
    %cst_20 = arith.constant 5.000000e-01 : f32
    %40 = vector.broadcast %cst_20 : f32 to vector<2x96xf32>
    %41 = arith.mulf %40, %39 : vector<2x96xf32>
    %42 = math.tanh %41 : vector<2x96xf32>
    %cst_21 = arith.constant 5.000000e-01 : f32
    %43 = vector.broadcast %cst_21 : f32 to vector<2x96xf32>
    %44 = arith.mulf %43, %42 : vector<2x96xf32>
    %cst_22 = arith.constant 5.000000e-01 : f32
    %45 = vector.broadcast %cst_22 : f32 to vector<2x96xf32>
    %46 = arith.addf %44, %45 : vector<2x96xf32>
    %47 = vector.extract_strided_slice %38 {offsets = [0, 96], sizes = [2, 32], strides = [1, 1]} : vector<2x128xf32> to vector<2x32xf32>
    %48 = math.tanh %47 : vector<2x32xf32>
    %49 = vector.extract_strided_slice %46 {offsets = [0, 0], sizes = [2, 32], strides = [1, 1]} : vector<2x96xf32> to vector<2x32xf32>
    %50 = vector.extract_strided_slice %46 {offsets = [0, 32], sizes = [2, 32], strides = [1, 1]} : vector<2x96xf32> to vector<2x32xf32>
    %51 = vector.extract_strided_slice %46 {offsets = [0, 64], sizes = [2, 32], strides = [1, 1]} : vector<2x96xf32> to vector<2x32xf32>
    %52 = arith.mulf %50, %8 : vector<2x32xf32>
    %53 = arith.mulf %49, %48 : vector<2x32xf32>
    %54 = arith.addf %52, %53 : vector<2x32xf32>
    %55 = math.tanh %54 : vector<2x32xf32>
    %56 = arith.mulf %51, %55 : vector<2x32xf32>
    %57 = vector.broadcast %6 : vector<1x32xf32> to vector<2x32xf32>
    %58 = arith.mulf %56, %57 : vector<2x32xf32>
    %cst_23 = arith.constant dense<0.000000e+00> : vector<2xf32>
    %59 = vector.multi_reduction <add>, %58, %cst_23 [1] : vector<2x32xf32> to vector<2xf32>
    %60 = vector.shape_cast %59 : vector<2xf32> to vector<2x1xf32>
    %61 = vector.broadcast %7 : vector<1x1xf32> to vector<2x1xf32>
    %62 = arith.addf %60, %61 : vector<2x1xf32>
    %63 = vector.extract_strided_slice %0 {offsets = [0, 1], sizes = [2, 1], strides = [1, 1]} : vector<2x8xf32> to vector<2x1xf32>
    %64 = vector.broadcast %63 : vector<2x1xf32> to vector<2x128xf32>
    %65 = vector.broadcast %1 : vector<1x128xf32> to vector<2x128xf32>
    %66 = arith.mulf %64, %65 : vector<2x128xf32>
    %cst_24 = arith.constant dense<0.000000e+00> : vector<2x128xf32>
    %67 = tpu.matmul %34, %2, %cst_24 {dimension_numbers = #tpu.dot_dimension_numbers<[1], [0], [0], [1], [0, 0, 1, 1], [], []>} : vector<2x32xf32>, vector<32x128xf32>, vector<2x128xf32> -> vector<2x128xf32>
    %68 = arith.addf %66, %67 : vector<2x128xf32>
    %69 = vector.broadcast %3 : vector<1x128xf32> to vector<2x128xf32>
    %70 = arith.addf %68, %69 : vector<2x128xf32>
    %71 = vector.extract_strided_slice %70 {offsets = [0, 0], sizes = [2, 96], strides = [1, 1]} : vector<2x128xf32> to vector<2x96xf32>
    %cst_25 = arith.constant 5.000000e-01 : f32
    %72 = vector.broadcast %cst_25 : f32 to vector<2x96xf32>
    %73 = arith.mulf %72, %71 : vector<2x96xf32>
    %74 = math.tanh %73 : vector<2x96xf32>
    %cst_26 = arith.constant 5.000000e-01 : f32
    %75 = vector.broadcast %cst_26 : f32 to vector<2x96xf32>
    %76 = arith.mulf %75, %74 : vector<2x96xf32>
    %cst_27 = arith.constant 5.000000e-01 : f32
    %77 = vector.broadcast %cst_27 : f32 to vector<2x96xf32>
    %78 = arith.addf %76, %77 : vector<2x96xf32>
    %79 = vector.extract_strided_slice %70 {offsets = [0, 96], sizes = [2, 32], strides = [1, 1]} : vector<2x128xf32> to vector<2x32xf32>
    %80 = math.tanh %79 : vector<2x32xf32>
    %81 = vector.extract_strided_slice %78 {offsets = [0, 0], sizes = [2, 32], strides = [1, 1]} : vector<2x96xf32> to vector<2x32xf32>
    %82 = vector.extract_strided_slice %78 {offsets = [0, 32], sizes = [2, 32], strides = [1, 1]} : vector<2x96xf32> to vector<2x32xf32>
    %83 = vector.extract_strided_slice %78 {offsets = [0, 64], sizes = [2, 32], strides = [1, 1]} : vector<2x96xf32> to vector<2x32xf32>
    %84 = arith.mulf %82, %32 : vector<2x32xf32>
    %85 = arith.mulf %81, %80 : vector<2x32xf32>
    %86 = arith.addf %84, %85 : vector<2x32xf32>
    %87 = math.tanh %86 : vector<2x32xf32>
    %88 = arith.mulf %83, %87 : vector<2x32xf32>
    %89 = tpu.concatenate %88, %56 in 1 : vector<2x32xf32>, vector<2x32xf32> -> vector<2x64xf32>
    %cst_28 = arith.constant dense<0.000000e+00> : vector<2x128xf32>
    %90 = tpu.matmul %89, %4, %cst_28 {dimension_numbers = #tpu.dot_dimension_numbers<[1], [0], [0], [1], [0, 0, 1, 1], [], []>} : vector<2x64xf32>, vector<64x128xf32>, vector<2x128xf32> -> vector<2x128xf32>
    %91 = vector.broadcast %5 : vector<1x128xf32> to vector<2x128xf32>
    %92 = arith.addf %90, %91 : vector<2x128xf32>
    %93 = vector.extract_strided_slice %92 {offsets = [0, 0], sizes = [2, 96], strides = [1, 1]} : vector<2x128xf32> to vector<2x96xf32>
    %cst_29 = arith.constant 5.000000e-01 : f32
    %94 = vector.broadcast %cst_29 : f32 to vector<2x96xf32>
    %95 = arith.mulf %94, %93 : vector<2x96xf32>
    %96 = math.tanh %95 : vector<2x96xf32>
    %cst_30 = arith.constant 5.000000e-01 : f32
    %97 = vector.broadcast %cst_30 : f32 to vector<2x96xf32>
    %98 = arith.mulf %97, %96 : vector<2x96xf32>
    %cst_31 = arith.constant 5.000000e-01 : f32
    %99 = vector.broadcast %cst_31 : f32 to vector<2x96xf32>
    %100 = arith.addf %98, %99 : vector<2x96xf32>
    %101 = vector.extract_strided_slice %92 {offsets = [0, 96], sizes = [2, 32], strides = [1, 1]} : vector<2x128xf32> to vector<2x32xf32>
    %102 = math.tanh %101 : vector<2x32xf32>
    %103 = vector.extract_strided_slice %100 {offsets = [0, 0], sizes = [2, 32], strides = [1, 1]} : vector<2x96xf32> to vector<2x32xf32>
    %104 = vector.extract_strided_slice %100 {offsets = [0, 32], sizes = [2, 32], strides = [1, 1]} : vector<2x96xf32> to vector<2x32xf32>
    %105 = vector.extract_strided_slice %100 {offsets = [0, 64], sizes = [2, 32], strides = [1, 1]} : vector<2x96xf32> to vector<2x32xf32>
    %106 = arith.mulf %104, %54 : vector<2x32xf32>
    %107 = arith.mulf %103, %102 : vector<2x32xf32>
    %108 = arith.addf %106, %107 : vector<2x32xf32>
    %109 = math.tanh %108 : vector<2x32xf32>
    %110 = arith.mulf %105, %109 : vector<2x32xf32>
    %111 = vector.broadcast %6 : vector<1x32xf32> to vector<2x32xf32>
    %112 = arith.mulf %110, %111 : vector<2x32xf32>
    %cst_32 = arith.constant dense<0.000000e+00> : vector<2xf32>
    %113 = vector.multi_reduction <add>, %112, %cst_32 [1] : vector<2x32xf32> to vector<2xf32>
    %114 = vector.shape_cast %113 : vector<2xf32> to vector<2x1xf32>
    %115 = vector.broadcast %7 : vector<1x1xf32> to vector<2x1xf32>
    %116 = arith.addf %114, %115 : vector<2x1xf32>
    %117 = vector.extract_strided_slice %0 {offsets = [0, 2], sizes = [2, 1], strides = [1, 1]} : vector<2x8xf32> to vector<2x1xf32>
    %118 = vector.broadcast %117 : vector<2x1xf32> to vector<2x128xf32>
    %119 = vector.broadcast %1 : vector<1x128xf32> to vector<2x128xf32>
    %120 = arith.mulf %118, %119 : vector<2x128xf32>
    %cst_33 = arith.constant dense<0.000000e+00> : vector<2x128xf32>
    %121 = tpu.matmul %88, %2, %cst_33 {dimension_numbers = #tpu.dot_dimension_numbers<[1], [0], [0], [1], [0, 0, 1, 1], [], []>} : vector<2x32xf32>, vector<32x128xf32>, vector<2x128xf32> -> vector<2x128xf32>
    %122 = arith.addf %120, %121 : vector<2x128xf32>
    %123 = vector.broadcast %3 : vector<1x128xf32> to vector<2x128xf32>
    %124 = arith.addf %122, %123 : vector<2x128xf32>
    %125 = vector.extract_strided_slice %124 {offsets = [0, 0], sizes = [2, 96], strides = [1, 1]} : vector<2x128xf32> to vector<2x96xf32>
    %cst_34 = arith.constant 5.000000e-01 : f32
    %126 = vector.broadcast %cst_34 : f32 to vector<2x96xf32>
    %127 = arith.mulf %126, %125 : vector<2x96xf32>
    %128 = math.tanh %127 : vector<2x96xf32>
    %cst_35 = arith.constant 5.000000e-01 : f32
    %129 = vector.broadcast %cst_35 : f32 to vector<2x96xf32>
    %130 = arith.mulf %129, %128 : vector<2x96xf32>
    %cst_36 = arith.constant 5.000000e-01 : f32
    %131 = vector.broadcast %cst_36 : f32 to vector<2x96xf32>
    %132 = arith.addf %130, %131 : vector<2x96xf32>
    %133 = vector.extract_strided_slice %124 {offsets = [0, 96], sizes = [2, 32], strides = [1, 1]} : vector<2x128xf32> to vector<2x32xf32>
    %134 = math.tanh %133 : vector<2x32xf32>
    %135 = vector.extract_strided_slice %132 {offsets = [0, 0], sizes = [2, 32], strides = [1, 1]} : vector<2x96xf32> to vector<2x32xf32>
    %136 = vector.extract_strided_slice %132 {offsets = [0, 32], sizes = [2, 32], strides = [1, 1]} : vector<2x96xf32> to vector<2x32xf32>
    %137 = vector.extract_strided_slice %132 {offsets = [0, 64], sizes = [2, 32], strides = [1, 1]} : vector<2x96xf32> to vector<2x32xf32>
    %138 = arith.mulf %136, %86 : vector<2x32xf32>
    %139 = arith.mulf %135, %134 : vector<2x32xf32>
    %140 = arith.addf %138, %139 : vector<2x32xf32>
    %141 = math.tanh %140 : vector<2x32xf32>
    %142 = arith.mulf %137, %141 : vector<2x32xf32>
    %143 = tpu.concatenate %142, %110 in 1 : vector<2x32xf32>, vector<2x32xf32> -> vector<2x64xf32>
    %cst_37 = arith.constant dense<0.000000e+00> : vector<2x128xf32>
    %144 = tpu.matmul %143, %4, %cst_37 {dimension_numbers = #tpu.dot_dimension_numbers<[1], [0], [0], [1], [0, 0, 1, 1], [], []>} : vector<2x64xf32>, vector<64x128xf32>, vector<2x128xf32> -> vector<2x128xf32>
    %145 = vector.broadcast %5 : vector<1x128xf32> to vector<2x128xf32>
    %146 = arith.addf %144, %145 : vector<2x128xf32>
    %147 = vector.extract_strided_slice %146 {offsets = [0, 0], sizes = [2, 96], strides = [1, 1]} : vector<2x128xf32> to vector<2x96xf32>
    %cst_38 = arith.constant 5.000000e-01 : f32
    %148 = vector.broadcast %cst_38 : f32 to vector<2x96xf32>
    %149 = arith.mulf %148, %147 : vector<2x96xf32>
    %150 = math.tanh %149 : vector<2x96xf32>
    %cst_39 = arith.constant 5.000000e-01 : f32
    %151 = vector.broadcast %cst_39 : f32 to vector<2x96xf32>
    %152 = arith.mulf %151, %150 : vector<2x96xf32>
    %cst_40 = arith.constant 5.000000e-01 : f32
    %153 = vector.broadcast %cst_40 : f32 to vector<2x96xf32>
    %154 = arith.addf %152, %153 : vector<2x96xf32>
    %155 = vector.extract_strided_slice %146 {offsets = [0, 96], sizes = [2, 32], strides = [1, 1]} : vector<2x128xf32> to vector<2x32xf32>
    %156 = math.tanh %155 : vector<2x32xf32>
    %157 = vector.extract_strided_slice %154 {offsets = [0, 0], sizes = [2, 32], strides = [1, 1]} : vector<2x96xf32> to vector<2x32xf32>
    %158 = vector.extract_strided_slice %154 {offsets = [0, 32], sizes = [2, 32], strides = [1, 1]} : vector<2x96xf32> to vector<2x32xf32>
    %159 = vector.extract_strided_slice %154 {offsets = [0, 64], sizes = [2, 32], strides = [1, 1]} : vector<2x96xf32> to vector<2x32xf32>
    %160 = arith.mulf %158, %108 : vector<2x32xf32>
    %161 = arith.mulf %157, %156 : vector<2x32xf32>
    %162 = arith.addf %160, %161 : vector<2x32xf32>
    %163 = math.tanh %162 : vector<2x32xf32>
    %164 = arith.mulf %159, %163 : vector<2x32xf32>
    %165 = vector.broadcast %6 : vector<1x32xf32> to vector<2x32xf32>
    %166 = arith.mulf %164, %165 : vector<2x32xf32>
    %cst_41 = arith.constant dense<0.000000e+00> : vector<2xf32>
    %167 = vector.multi_reduction <add>, %166, %cst_41 [1] : vector<2x32xf32> to vector<2xf32>
    %168 = vector.shape_cast %167 : vector<2xf32> to vector<2x1xf32>
    %169 = vector.broadcast %7 : vector<1x1xf32> to vector<2x1xf32>
    %170 = arith.addf %168, %169 : vector<2x1xf32>
    %171 = vector.extract_strided_slice %0 {offsets = [0, 3], sizes = [2, 1], strides = [1, 1]} : vector<2x8xf32> to vector<2x1xf32>
    %172 = vector.broadcast %171 : vector<2x1xf32> to vector<2x128xf32>
    %173 = vector.broadcast %1 : vector<1x128xf32> to vector<2x128xf32>
    %174 = arith.mulf %172, %173 : vector<2x128xf32>
    %cst_42 = arith.constant dense<0.000000e+00> : vector<2x128xf32>
    %175 = tpu.matmul %142, %2, %cst_42 {dimension_numbers = #tpu.dot_dimension_numbers<[1], [0], [0], [1], [0, 0, 1, 1], [], []>} : vector<2x32xf32>, vector<32x128xf32>, vector<2x128xf32> -> vector<2x128xf32>
    %176 = arith.addf %174, %175 : vector<2x128xf32>
    %177 = vector.broadcast %3 : vector<1x128xf32> to vector<2x128xf32>
    %178 = arith.addf %176, %177 : vector<2x128xf32>
    %179 = vector.extract_strided_slice %178 {offsets = [0, 0], sizes = [2, 96], strides = [1, 1]} : vector<2x128xf32> to vector<2x96xf32>
    %cst_43 = arith.constant 5.000000e-01 : f32
    %180 = vector.broadcast %cst_43 : f32 to vector<2x96xf32>
    %181 = arith.mulf %180, %179 : vector<2x96xf32>
    %182 = math.tanh %181 : vector<2x96xf32>
    %cst_44 = arith.constant 5.000000e-01 : f32
    %183 = vector.broadcast %cst_44 : f32 to vector<2x96xf32>
    %184 = arith.mulf %183, %182 : vector<2x96xf32>
    %cst_45 = arith.constant 5.000000e-01 : f32
    %185 = vector.broadcast %cst_45 : f32 to vector<2x96xf32>
    %186 = arith.addf %184, %185 : vector<2x96xf32>
    %187 = vector.extract_strided_slice %178 {offsets = [0, 96], sizes = [2, 32], strides = [1, 1]} : vector<2x128xf32> to vector<2x32xf32>
    %188 = math.tanh %187 : vector<2x32xf32>
    %189 = vector.extract_strided_slice %186 {offsets = [0, 0], sizes = [2, 32], strides = [1, 1]} : vector<2x96xf32> to vector<2x32xf32>
    %190 = vector.extract_strided_slice %186 {offsets = [0, 32], sizes = [2, 32], strides = [1, 1]} : vector<2x96xf32> to vector<2x32xf32>
    %191 = vector.extract_strided_slice %186 {offsets = [0, 64], sizes = [2, 32], strides = [1, 1]} : vector<2x96xf32> to vector<2x32xf32>
    %192 = arith.mulf %190, %140 : vector<2x32xf32>
    %193 = arith.mulf %189, %188 : vector<2x32xf32>
    %194 = arith.addf %192, %193 : vector<2x32xf32>
    %195 = math.tanh %194 : vector<2x32xf32>
    %196 = arith.mulf %191, %195 : vector<2x32xf32>
    %197 = tpu.concatenate %196, %164 in 1 : vector<2x32xf32>, vector<2x32xf32> -> vector<2x64xf32>
    %cst_46 = arith.constant dense<0.000000e+00> : vector<2x128xf32>
    %198 = tpu.matmul %197, %4, %cst_46 {dimension_numbers = #tpu.dot_dimension_numbers<[1], [0], [0], [1], [0, 0, 1, 1], [], []>} : vector<2x64xf32>, vector<64x128xf32>, vector<2x128xf32> -> vector<2x128xf32>
    %199 = vector.broadcast %5 : vector<1x128xf32> to vector<2x128xf32>
    %200 = arith.addf %198, %199 : vector<2x128xf32>
    %201 = vector.extract_strided_slice %200 {offsets = [0, 0], sizes = [2, 96], strides = [1, 1]} : vector<2x128xf32> to vector<2x96xf32>
    %cst_47 = arith.constant 5.000000e-01 : f32
    %202 = vector.broadcast %cst_47 : f32 to vector<2x96xf32>
    %203 = arith.mulf %202, %201 : vector<2x96xf32>
    %204 = math.tanh %203 : vector<2x96xf32>
    %cst_48 = arith.constant 5.000000e-01 : f32
    %205 = vector.broadcast %cst_48 : f32 to vector<2x96xf32>
    %206 = arith.mulf %205, %204 : vector<2x96xf32>
    %cst_49 = arith.constant 5.000000e-01 : f32
    %207 = vector.broadcast %cst_49 : f32 to vector<2x96xf32>
    %208 = arith.addf %206, %207 : vector<2x96xf32>
    %209 = vector.extract_strided_slice %200 {offsets = [0, 96], sizes = [2, 32], strides = [1, 1]} : vector<2x128xf32> to vector<2x32xf32>
    %210 = math.tanh %209 : vector<2x32xf32>
    %211 = vector.extract_strided_slice %208 {offsets = [0, 0], sizes = [2, 32], strides = [1, 1]} : vector<2x96xf32> to vector<2x32xf32>
    %212 = vector.extract_strided_slice %208 {offsets = [0, 32], sizes = [2, 32], strides = [1, 1]} : vector<2x96xf32> to vector<2x32xf32>
    %213 = vector.extract_strided_slice %208 {offsets = [0, 64], sizes = [2, 32], strides = [1, 1]} : vector<2x96xf32> to vector<2x32xf32>
    %214 = arith.mulf %212, %162 : vector<2x32xf32>
    %215 = arith.mulf %211, %210 : vector<2x32xf32>
    %216 = arith.addf %214, %215 : vector<2x32xf32>
    %217 = math.tanh %216 : vector<2x32xf32>
    %218 = arith.mulf %213, %217 : vector<2x32xf32>
    %219 = vector.broadcast %6 : vector<1x32xf32> to vector<2x32xf32>
    %220 = arith.mulf %218, %219 : vector<2x32xf32>
    %cst_50 = arith.constant dense<0.000000e+00> : vector<2xf32>
    %221 = vector.multi_reduction <add>, %220, %cst_50 [1] : vector<2x32xf32> to vector<2xf32>
    %222 = vector.shape_cast %221 : vector<2xf32> to vector<2x1xf32>
    %223 = vector.broadcast %7 : vector<1x1xf32> to vector<2x1xf32>
    %224 = arith.addf %222, %223 : vector<2x1xf32>
    %225 = vector.extract_strided_slice %0 {offsets = [0, 4], sizes = [2, 1], strides = [1, 1]} : vector<2x8xf32> to vector<2x1xf32>
    %226 = vector.broadcast %225 : vector<2x1xf32> to vector<2x128xf32>
    %227 = vector.broadcast %1 : vector<1x128xf32> to vector<2x128xf32>
    %228 = arith.mulf %226, %227 : vector<2x128xf32>
    %cst_51 = arith.constant dense<0.000000e+00> : vector<2x128xf32>
    %229 = tpu.matmul %196, %2, %cst_51 {dimension_numbers = #tpu.dot_dimension_numbers<[1], [0], [0], [1], [0, 0, 1, 1], [], []>} : vector<2x32xf32>, vector<32x128xf32>, vector<2x128xf32> -> vector<2x128xf32>
    %230 = arith.addf %228, %229 : vector<2x128xf32>
    %231 = vector.broadcast %3 : vector<1x128xf32> to vector<2x128xf32>
    %232 = arith.addf %230, %231 : vector<2x128xf32>
    %233 = vector.extract_strided_slice %232 {offsets = [0, 0], sizes = [2, 96], strides = [1, 1]} : vector<2x128xf32> to vector<2x96xf32>
    %cst_52 = arith.constant 5.000000e-01 : f32
    %234 = vector.broadcast %cst_52 : f32 to vector<2x96xf32>
    %235 = arith.mulf %234, %233 : vector<2x96xf32>
    %236 = math.tanh %235 : vector<2x96xf32>
    %cst_53 = arith.constant 5.000000e-01 : f32
    %237 = vector.broadcast %cst_53 : f32 to vector<2x96xf32>
    %238 = arith.mulf %237, %236 : vector<2x96xf32>
    %cst_54 = arith.constant 5.000000e-01 : f32
    %239 = vector.broadcast %cst_54 : f32 to vector<2x96xf32>
    %240 = arith.addf %238, %239 : vector<2x96xf32>
    %241 = vector.extract_strided_slice %232 {offsets = [0, 96], sizes = [2, 32], strides = [1, 1]} : vector<2x128xf32> to vector<2x32xf32>
    %242 = math.tanh %241 : vector<2x32xf32>
    %243 = vector.extract_strided_slice %240 {offsets = [0, 0], sizes = [2, 32], strides = [1, 1]} : vector<2x96xf32> to vector<2x32xf32>
    %244 = vector.extract_strided_slice %240 {offsets = [0, 32], sizes = [2, 32], strides = [1, 1]} : vector<2x96xf32> to vector<2x32xf32>
    %245 = vector.extract_strided_slice %240 {offsets = [0, 64], sizes = [2, 32], strides = [1, 1]} : vector<2x96xf32> to vector<2x32xf32>
    %246 = arith.mulf %244, %194 : vector<2x32xf32>
    %247 = arith.mulf %243, %242 : vector<2x32xf32>
    %248 = arith.addf %246, %247 : vector<2x32xf32>
    %249 = math.tanh %248 : vector<2x32xf32>
    %250 = arith.mulf %245, %249 : vector<2x32xf32>
    %251 = tpu.concatenate %250, %218 in 1 : vector<2x32xf32>, vector<2x32xf32> -> vector<2x64xf32>
    %cst_55 = arith.constant dense<0.000000e+00> : vector<2x128xf32>
    %252 = tpu.matmul %251, %4, %cst_55 {dimension_numbers = #tpu.dot_dimension_numbers<[1], [0], [0], [1], [0, 0, 1, 1], [], []>} : vector<2x64xf32>, vector<64x128xf32>, vector<2x128xf32> -> vector<2x128xf32>
    %253 = vector.broadcast %5 : vector<1x128xf32> to vector<2x128xf32>
    %254 = arith.addf %252, %253 : vector<2x128xf32>
    %255 = vector.extract_strided_slice %254 {offsets = [0, 0], sizes = [2, 96], strides = [1, 1]} : vector<2x128xf32> to vector<2x96xf32>
    %cst_56 = arith.constant 5.000000e-01 : f32
    %256 = vector.broadcast %cst_56 : f32 to vector<2x96xf32>
    %257 = arith.mulf %256, %255 : vector<2x96xf32>
    %258 = math.tanh %257 : vector<2x96xf32>
    %cst_57 = arith.constant 5.000000e-01 : f32
    %259 = vector.broadcast %cst_57 : f32 to vector<2x96xf32>
    %260 = arith.mulf %259, %258 : vector<2x96xf32>
    %cst_58 = arith.constant 5.000000e-01 : f32
    %261 = vector.broadcast %cst_58 : f32 to vector<2x96xf32>
    %262 = arith.addf %260, %261 : vector<2x96xf32>
    %263 = vector.extract_strided_slice %254 {offsets = [0, 96], sizes = [2, 32], strides = [1, 1]} : vector<2x128xf32> to vector<2x32xf32>
    %264 = math.tanh %263 : vector<2x32xf32>
    %265 = vector.extract_strided_slice %262 {offsets = [0, 0], sizes = [2, 32], strides = [1, 1]} : vector<2x96xf32> to vector<2x32xf32>
    %266 = vector.extract_strided_slice %262 {offsets = [0, 32], sizes = [2, 32], strides = [1, 1]} : vector<2x96xf32> to vector<2x32xf32>
    %267 = vector.extract_strided_slice %262 {offsets = [0, 64], sizes = [2, 32], strides = [1, 1]} : vector<2x96xf32> to vector<2x32xf32>
    %268 = arith.mulf %266, %216 : vector<2x32xf32>
    %269 = arith.mulf %265, %264 : vector<2x32xf32>
    %270 = arith.addf %268, %269 : vector<2x32xf32>
    %271 = math.tanh %270 : vector<2x32xf32>
    %272 = arith.mulf %267, %271 : vector<2x32xf32>
    %273 = vector.broadcast %6 : vector<1x32xf32> to vector<2x32xf32>
    %274 = arith.mulf %272, %273 : vector<2x32xf32>
    %cst_59 = arith.constant dense<0.000000e+00> : vector<2xf32>
    %275 = vector.multi_reduction <add>, %274, %cst_59 [1] : vector<2x32xf32> to vector<2xf32>
    %276 = vector.shape_cast %275 : vector<2xf32> to vector<2x1xf32>
    %277 = vector.broadcast %7 : vector<1x1xf32> to vector<2x1xf32>
    %278 = arith.addf %276, %277 : vector<2x1xf32>
    %279 = vector.extract_strided_slice %0 {offsets = [0, 5], sizes = [2, 1], strides = [1, 1]} : vector<2x8xf32> to vector<2x1xf32>
    %280 = vector.broadcast %279 : vector<2x1xf32> to vector<2x128xf32>
    %281 = vector.broadcast %1 : vector<1x128xf32> to vector<2x128xf32>
    %282 = arith.mulf %280, %281 : vector<2x128xf32>
    %cst_60 = arith.constant dense<0.000000e+00> : vector<2x128xf32>
    %283 = tpu.matmul %250, %2, %cst_60 {dimension_numbers = #tpu.dot_dimension_numbers<[1], [0], [0], [1], [0, 0, 1, 1], [], []>} : vector<2x32xf32>, vector<32x128xf32>, vector<2x128xf32> -> vector<2x128xf32>
    %284 = arith.addf %282, %283 : vector<2x128xf32>
    %285 = vector.broadcast %3 : vector<1x128xf32> to vector<2x128xf32>
    %286 = arith.addf %284, %285 : vector<2x128xf32>
    %287 = vector.extract_strided_slice %286 {offsets = [0, 0], sizes = [2, 96], strides = [1, 1]} : vector<2x128xf32> to vector<2x96xf32>
    %cst_61 = arith.constant 5.000000e-01 : f32
    %288 = vector.broadcast %cst_61 : f32 to vector<2x96xf32>
    %289 = arith.mulf %288, %287 : vector<2x96xf32>
    %290 = math.tanh %289 : vector<2x96xf32>
    %cst_62 = arith.constant 5.000000e-01 : f32
    %291 = vector.broadcast %cst_62 : f32 to vector<2x96xf32>
    %292 = arith.mulf %291, %290 : vector<2x96xf32>
    %cst_63 = arith.constant 5.000000e-01 : f32
    %293 = vector.broadcast %cst_63 : f32 to vector<2x96xf32>
    %294 = arith.addf %292, %293 : vector<2x96xf32>
    %295 = vector.extract_strided_slice %286 {offsets = [0, 96], sizes = [2, 32], strides = [1, 1]} : vector<2x128xf32> to vector<2x32xf32>
    %296 = math.tanh %295 : vector<2x32xf32>
    %297 = vector.extract_strided_slice %294 {offsets = [0, 0], sizes = [2, 32], strides = [1, 1]} : vector<2x96xf32> to vector<2x32xf32>
    %298 = vector.extract_strided_slice %294 {offsets = [0, 32], sizes = [2, 32], strides = [1, 1]} : vector<2x96xf32> to vector<2x32xf32>
    %299 = vector.extract_strided_slice %294 {offsets = [0, 64], sizes = [2, 32], strides = [1, 1]} : vector<2x96xf32> to vector<2x32xf32>
    %300 = arith.mulf %298, %248 : vector<2x32xf32>
    %301 = arith.mulf %297, %296 : vector<2x32xf32>
    %302 = arith.addf %300, %301 : vector<2x32xf32>
    %303 = math.tanh %302 : vector<2x32xf32>
    %304 = arith.mulf %299, %303 : vector<2x32xf32>
    %305 = tpu.concatenate %304, %272 in 1 : vector<2x32xf32>, vector<2x32xf32> -> vector<2x64xf32>
    %cst_64 = arith.constant dense<0.000000e+00> : vector<2x128xf32>
    %306 = tpu.matmul %305, %4, %cst_64 {dimension_numbers = #tpu.dot_dimension_numbers<[1], [0], [0], [1], [0, 0, 1, 1], [], []>} : vector<2x64xf32>, vector<64x128xf32>, vector<2x128xf32> -> vector<2x128xf32>
    %307 = vector.broadcast %5 : vector<1x128xf32> to vector<2x128xf32>
    %308 = arith.addf %306, %307 : vector<2x128xf32>
    %309 = vector.extract_strided_slice %308 {offsets = [0, 0], sizes = [2, 96], strides = [1, 1]} : vector<2x128xf32> to vector<2x96xf32>
    %cst_65 = arith.constant 5.000000e-01 : f32
    %310 = vector.broadcast %cst_65 : f32 to vector<2x96xf32>
    %311 = arith.mulf %310, %309 : vector<2x96xf32>
    %312 = math.tanh %311 : vector<2x96xf32>
    %cst_66 = arith.constant 5.000000e-01 : f32
    %313 = vector.broadcast %cst_66 : f32 to vector<2x96xf32>
    %314 = arith.mulf %313, %312 : vector<2x96xf32>
    %cst_67 = arith.constant 5.000000e-01 : f32
    %315 = vector.broadcast %cst_67 : f32 to vector<2x96xf32>
    %316 = arith.addf %314, %315 : vector<2x96xf32>
    %317 = vector.extract_strided_slice %308 {offsets = [0, 96], sizes = [2, 32], strides = [1, 1]} : vector<2x128xf32> to vector<2x32xf32>
    %318 = math.tanh %317 : vector<2x32xf32>
    %319 = vector.extract_strided_slice %316 {offsets = [0, 0], sizes = [2, 32], strides = [1, 1]} : vector<2x96xf32> to vector<2x32xf32>
    %320 = vector.extract_strided_slice %316 {offsets = [0, 32], sizes = [2, 32], strides = [1, 1]} : vector<2x96xf32> to vector<2x32xf32>
    %321 = vector.extract_strided_slice %316 {offsets = [0, 64], sizes = [2, 32], strides = [1, 1]} : vector<2x96xf32> to vector<2x32xf32>
    %322 = arith.mulf %320, %270 : vector<2x32xf32>
    %323 = arith.mulf %319, %318 : vector<2x32xf32>
    %324 = arith.addf %322, %323 : vector<2x32xf32>
    %325 = math.tanh %324 : vector<2x32xf32>
    %326 = arith.mulf %321, %325 : vector<2x32xf32>
    %327 = vector.broadcast %6 : vector<1x32xf32> to vector<2x32xf32>
    %328 = arith.mulf %326, %327 : vector<2x32xf32>
    %cst_68 = arith.constant dense<0.000000e+00> : vector<2xf32>
    %329 = vector.multi_reduction <add>, %328, %cst_68 [1] : vector<2x32xf32> to vector<2xf32>
    %330 = vector.shape_cast %329 : vector<2xf32> to vector<2x1xf32>
    %331 = vector.broadcast %7 : vector<1x1xf32> to vector<2x1xf32>
    %332 = arith.addf %330, %331 : vector<2x1xf32>
    %333 = vector.extract_strided_slice %0 {offsets = [0, 6], sizes = [2, 1], strides = [1, 1]} : vector<2x8xf32> to vector<2x1xf32>
    %334 = vector.broadcast %333 : vector<2x1xf32> to vector<2x128xf32>
    %335 = vector.broadcast %1 : vector<1x128xf32> to vector<2x128xf32>
    %336 = arith.mulf %334, %335 : vector<2x128xf32>
    %cst_69 = arith.constant dense<0.000000e+00> : vector<2x128xf32>
    %337 = tpu.matmul %304, %2, %cst_69 {dimension_numbers = #tpu.dot_dimension_numbers<[1], [0], [0], [1], [0, 0, 1, 1], [], []>} : vector<2x32xf32>, vector<32x128xf32>, vector<2x128xf32> -> vector<2x128xf32>
    %338 = arith.addf %336, %337 : vector<2x128xf32>
    %339 = vector.broadcast %3 : vector<1x128xf32> to vector<2x128xf32>
    %340 = arith.addf %338, %339 : vector<2x128xf32>
    %341 = vector.extract_strided_slice %340 {offsets = [0, 0], sizes = [2, 96], strides = [1, 1]} : vector<2x128xf32> to vector<2x96xf32>
    %cst_70 = arith.constant 5.000000e-01 : f32
    %342 = vector.broadcast %cst_70 : f32 to vector<2x96xf32>
    %343 = arith.mulf %342, %341 : vector<2x96xf32>
    %344 = math.tanh %343 : vector<2x96xf32>
    %cst_71 = arith.constant 5.000000e-01 : f32
    %345 = vector.broadcast %cst_71 : f32 to vector<2x96xf32>
    %346 = arith.mulf %345, %344 : vector<2x96xf32>
    %cst_72 = arith.constant 5.000000e-01 : f32
    %347 = vector.broadcast %cst_72 : f32 to vector<2x96xf32>
    %348 = arith.addf %346, %347 : vector<2x96xf32>
    %349 = vector.extract_strided_slice %340 {offsets = [0, 96], sizes = [2, 32], strides = [1, 1]} : vector<2x128xf32> to vector<2x32xf32>
    %350 = math.tanh %349 : vector<2x32xf32>
    %351 = vector.extract_strided_slice %348 {offsets = [0, 0], sizes = [2, 32], strides = [1, 1]} : vector<2x96xf32> to vector<2x32xf32>
    %352 = vector.extract_strided_slice %348 {offsets = [0, 32], sizes = [2, 32], strides = [1, 1]} : vector<2x96xf32> to vector<2x32xf32>
    %353 = vector.extract_strided_slice %348 {offsets = [0, 64], sizes = [2, 32], strides = [1, 1]} : vector<2x96xf32> to vector<2x32xf32>
    %354 = arith.mulf %352, %302 : vector<2x32xf32>
    %355 = arith.mulf %351, %350 : vector<2x32xf32>
    %356 = arith.addf %354, %355 : vector<2x32xf32>
    %357 = math.tanh %356 : vector<2x32xf32>
    %358 = arith.mulf %353, %357 : vector<2x32xf32>
    %359 = tpu.concatenate %358, %326 in 1 : vector<2x32xf32>, vector<2x32xf32> -> vector<2x64xf32>
    %cst_73 = arith.constant dense<0.000000e+00> : vector<2x128xf32>
    %360 = tpu.matmul %359, %4, %cst_73 {dimension_numbers = #tpu.dot_dimension_numbers<[1], [0], [0], [1], [0, 0, 1, 1], [], []>} : vector<2x64xf32>, vector<64x128xf32>, vector<2x128xf32> -> vector<2x128xf32>
    %361 = vector.broadcast %5 : vector<1x128xf32> to vector<2x128xf32>
    %362 = arith.addf %360, %361 : vector<2x128xf32>
    %363 = vector.extract_strided_slice %362 {offsets = [0, 0], sizes = [2, 96], strides = [1, 1]} : vector<2x128xf32> to vector<2x96xf32>
    %cst_74 = arith.constant 5.000000e-01 : f32
    %364 = vector.broadcast %cst_74 : f32 to vector<2x96xf32>
    %365 = arith.mulf %364, %363 : vector<2x96xf32>
    %366 = math.tanh %365 : vector<2x96xf32>
    %cst_75 = arith.constant 5.000000e-01 : f32
    %367 = vector.broadcast %cst_75 : f32 to vector<2x96xf32>
    %368 = arith.mulf %367, %366 : vector<2x96xf32>
    %cst_76 = arith.constant 5.000000e-01 : f32
    %369 = vector.broadcast %cst_76 : f32 to vector<2x96xf32>
    %370 = arith.addf %368, %369 : vector<2x96xf32>
    %371 = vector.extract_strided_slice %362 {offsets = [0, 96], sizes = [2, 32], strides = [1, 1]} : vector<2x128xf32> to vector<2x32xf32>
    %372 = math.tanh %371 : vector<2x32xf32>
    %373 = vector.extract_strided_slice %370 {offsets = [0, 0], sizes = [2, 32], strides = [1, 1]} : vector<2x96xf32> to vector<2x32xf32>
    %374 = vector.extract_strided_slice %370 {offsets = [0, 32], sizes = [2, 32], strides = [1, 1]} : vector<2x96xf32> to vector<2x32xf32>
    %375 = vector.extract_strided_slice %370 {offsets = [0, 64], sizes = [2, 32], strides = [1, 1]} : vector<2x96xf32> to vector<2x32xf32>
    %376 = arith.mulf %374, %324 : vector<2x32xf32>
    %377 = arith.mulf %373, %372 : vector<2x32xf32>
    %378 = arith.addf %376, %377 : vector<2x32xf32>
    %379 = math.tanh %378 : vector<2x32xf32>
    %380 = arith.mulf %375, %379 : vector<2x32xf32>
    %381 = vector.broadcast %6 : vector<1x32xf32> to vector<2x32xf32>
    %382 = arith.mulf %380, %381 : vector<2x32xf32>
    %cst_77 = arith.constant dense<0.000000e+00> : vector<2xf32>
    %383 = vector.multi_reduction <add>, %382, %cst_77 [1] : vector<2x32xf32> to vector<2xf32>
    %384 = vector.shape_cast %383 : vector<2xf32> to vector<2x1xf32>
    %385 = vector.broadcast %7 : vector<1x1xf32> to vector<2x1xf32>
    %386 = arith.addf %384, %385 : vector<2x1xf32>
    %387 = vector.extract_strided_slice %0 {offsets = [0, 7], sizes = [2, 1], strides = [1, 1]} : vector<2x8xf32> to vector<2x1xf32>
    %388 = vector.broadcast %387 : vector<2x1xf32> to vector<2x128xf32>
    %389 = vector.broadcast %1 : vector<1x128xf32> to vector<2x128xf32>
    %390 = arith.mulf %388, %389 : vector<2x128xf32>
    %cst_78 = arith.constant dense<0.000000e+00> : vector<2x128xf32>
    %391 = tpu.matmul %358, %2, %cst_78 {dimension_numbers = #tpu.dot_dimension_numbers<[1], [0], [0], [1], [0, 0, 1, 1], [], []>} : vector<2x32xf32>, vector<32x128xf32>, vector<2x128xf32> -> vector<2x128xf32>
    %392 = arith.addf %390, %391 : vector<2x128xf32>
    %393 = vector.broadcast %3 : vector<1x128xf32> to vector<2x128xf32>
    %394 = arith.addf %392, %393 : vector<2x128xf32>
    %395 = vector.extract_strided_slice %394 {offsets = [0, 0], sizes = [2, 96], strides = [1, 1]} : vector<2x128xf32> to vector<2x96xf32>
    %cst_79 = arith.constant 5.000000e-01 : f32
    %396 = vector.broadcast %cst_79 : f32 to vector<2x96xf32>
    %397 = arith.mulf %396, %395 : vector<2x96xf32>
    %398 = math.tanh %397 : vector<2x96xf32>
    %cst_80 = arith.constant 5.000000e-01 : f32
    %399 = vector.broadcast %cst_80 : f32 to vector<2x96xf32>
    %400 = arith.mulf %399, %398 : vector<2x96xf32>
    %cst_81 = arith.constant 5.000000e-01 : f32
    %401 = vector.broadcast %cst_81 : f32 to vector<2x96xf32>
    %402 = arith.addf %400, %401 : vector<2x96xf32>
    %403 = vector.extract_strided_slice %394 {offsets = [0, 96], sizes = [2, 32], strides = [1, 1]} : vector<2x128xf32> to vector<2x32xf32>
    %404 = math.tanh %403 : vector<2x32xf32>
    %405 = vector.extract_strided_slice %402 {offsets = [0, 0], sizes = [2, 32], strides = [1, 1]} : vector<2x96xf32> to vector<2x32xf32>
    %406 = vector.extract_strided_slice %402 {offsets = [0, 32], sizes = [2, 32], strides = [1, 1]} : vector<2x96xf32> to vector<2x32xf32>
    %407 = vector.extract_strided_slice %402 {offsets = [0, 64], sizes = [2, 32], strides = [1, 1]} : vector<2x96xf32> to vector<2x32xf32>
    %408 = arith.mulf %406, %356 : vector<2x32xf32>
    %409 = arith.mulf %405, %404 : vector<2x32xf32>
    %410 = arith.addf %408, %409 : vector<2x32xf32>
    %411 = math.tanh %410 : vector<2x32xf32>
    %412 = arith.mulf %407, %411 : vector<2x32xf32>
    %413 = tpu.concatenate %412, %380 in 1 : vector<2x32xf32>, vector<2x32xf32> -> vector<2x64xf32>
    %cst_82 = arith.constant dense<0.000000e+00> : vector<2x128xf32>
    %414 = tpu.matmul %413, %4, %cst_82 {dimension_numbers = #tpu.dot_dimension_numbers<[1], [0], [0], [1], [0, 0, 1, 1], [], []>} : vector<2x64xf32>, vector<64x128xf32>, vector<2x128xf32> -> vector<2x128xf32>
    %415 = vector.broadcast %5 : vector<1x128xf32> to vector<2x128xf32>
    %416 = arith.addf %414, %415 : vector<2x128xf32>
    %417 = vector.extract_strided_slice %416 {offsets = [0, 0], sizes = [2, 96], strides = [1, 1]} : vector<2x128xf32> to vector<2x96xf32>
    %cst_83 = arith.constant 5.000000e-01 : f32
    %418 = vector.broadcast %cst_83 : f32 to vector<2x96xf32>
    %419 = arith.mulf %418, %417 : vector<2x96xf32>
    %420 = math.tanh %419 : vector<2x96xf32>
    %cst_84 = arith.constant 5.000000e-01 : f32
    %421 = vector.broadcast %cst_84 : f32 to vector<2x96xf32>
    %422 = arith.mulf %421, %420 : vector<2x96xf32>
    %cst_85 = arith.constant 5.000000e-01 : f32
    %423 = vector.broadcast %cst_85 : f32 to vector<2x96xf32>
    %424 = arith.addf %422, %423 : vector<2x96xf32>
    %425 = vector.extract_strided_slice %416 {offsets = [0, 96], sizes = [2, 32], strides = [1, 1]} : vector<2x128xf32> to vector<2x32xf32>
    %426 = math.tanh %425 : vector<2x32xf32>
    %427 = vector.extract_strided_slice %424 {offsets = [0, 0], sizes = [2, 32], strides = [1, 1]} : vector<2x96xf32> to vector<2x32xf32>
    %428 = vector.extract_strided_slice %424 {offsets = [0, 32], sizes = [2, 32], strides = [1, 1]} : vector<2x96xf32> to vector<2x32xf32>
    %429 = vector.extract_strided_slice %424 {offsets = [0, 64], sizes = [2, 32], strides = [1, 1]} : vector<2x96xf32> to vector<2x32xf32>
    %430 = arith.mulf %428, %378 : vector<2x32xf32>
    %431 = arith.mulf %427, %426 : vector<2x32xf32>
    %432 = arith.addf %430, %431 : vector<2x32xf32>
    %433 = math.tanh %432 : vector<2x32xf32>
    %434 = arith.mulf %429, %433 : vector<2x32xf32>
    %435 = vector.broadcast %6 : vector<1x32xf32> to vector<2x32xf32>
    %436 = arith.mulf %434, %435 : vector<2x32xf32>
    %cst_86 = arith.constant dense<0.000000e+00> : vector<2xf32>
    %437 = vector.multi_reduction <add>, %436, %cst_86 [1] : vector<2x32xf32> to vector<2xf32>
    %438 = vector.shape_cast %437 : vector<2xf32> to vector<2x1xf32>
    %439 = vector.broadcast %7 : vector<1x1xf32> to vector<2x1xf32>
    %440 = arith.addf %438, %439 : vector<2x1xf32>
    %441 = vector.broadcast %440 : vector<2x1xf32> to vector<2x128xf32>
    %442 = vector.broadcast %1 : vector<1x128xf32> to vector<2x128xf32>
    %443 = arith.mulf %441, %442 : vector<2x128xf32>
    %cst_87 = arith.constant dense<0.000000e+00> : vector<2x128xf32>
    %444 = tpu.matmul %412, %2, %cst_87 {dimension_numbers = #tpu.dot_dimension_numbers<[1], [0], [0], [1], [0, 0, 1, 1], [], []>} : vector<2x32xf32>, vector<32x128xf32>, vector<2x128xf32> -> vector<2x128xf32>
    %445 = arith.addf %443, %444 : vector<2x128xf32>
    %446 = vector.broadcast %3 : vector<1x128xf32> to vector<2x128xf32>
    %447 = arith.addf %445, %446 : vector<2x128xf32>
    %448 = vector.extract_strided_slice %447 {offsets = [0, 0], sizes = [2, 96], strides = [1, 1]} : vector<2x128xf32> to vector<2x96xf32>
    %cst_88 = arith.constant 5.000000e-01 : f32
    %449 = vector.broadcast %cst_88 : f32 to vector<2x96xf32>
    %450 = arith.mulf %449, %448 : vector<2x96xf32>
    %451 = math.tanh %450 : vector<2x96xf32>
    %cst_89 = arith.constant 5.000000e-01 : f32
    %452 = vector.broadcast %cst_89 : f32 to vector<2x96xf32>
    %453 = arith.mulf %452, %451 : vector<2x96xf32>
    %cst_90 = arith.constant 5.000000e-01 : f32
    %454 = vector.broadcast %cst_90 : f32 to vector<2x96xf32>
    %455 = arith.addf %453, %454 : vector<2x96xf32>
    %456 = vector.extract_strided_slice %447 {offsets = [0, 96], sizes = [2, 32], strides = [1, 1]} : vector<2x128xf32> to vector<2x32xf32>
    %457 = math.tanh %456 : vector<2x32xf32>
    %458 = vector.extract_strided_slice %455 {offsets = [0, 0], sizes = [2, 32], strides = [1, 1]} : vector<2x96xf32> to vector<2x32xf32>
    %459 = vector.extract_strided_slice %455 {offsets = [0, 32], sizes = [2, 32], strides = [1, 1]} : vector<2x96xf32> to vector<2x32xf32>
    %460 = vector.extract_strided_slice %455 {offsets = [0, 64], sizes = [2, 32], strides = [1, 1]} : vector<2x96xf32> to vector<2x32xf32>
    %461 = arith.mulf %459, %410 : vector<2x32xf32>
    %462 = arith.mulf %458, %457 : vector<2x32xf32>
    %463 = arith.addf %461, %462 : vector<2x32xf32>
    %464 = math.tanh %463 : vector<2x32xf32>
    %465 = arith.mulf %460, %464 : vector<2x32xf32>
    %466 = tpu.concatenate %465, %434 in 1 : vector<2x32xf32>, vector<2x32xf32> -> vector<2x64xf32>
    %cst_91 = arith.constant dense<0.000000e+00> : vector<2x128xf32>
    %467 = tpu.matmul %466, %4, %cst_91 {dimension_numbers = #tpu.dot_dimension_numbers<[1], [0], [0], [1], [0, 0, 1, 1], [], []>} : vector<2x64xf32>, vector<64x128xf32>, vector<2x128xf32> -> vector<2x128xf32>
    %468 = vector.broadcast %5 : vector<1x128xf32> to vector<2x128xf32>
    %469 = arith.addf %467, %468 : vector<2x128xf32>
    %470 = vector.extract_strided_slice %469 {offsets = [0, 0], sizes = [2, 96], strides = [1, 1]} : vector<2x128xf32> to vector<2x96xf32>
    %cst_92 = arith.constant 5.000000e-01 : f32
    %471 = vector.broadcast %cst_92 : f32 to vector<2x96xf32>
    %472 = arith.mulf %471, %470 : vector<2x96xf32>
    %473 = math.tanh %472 : vector<2x96xf32>
    %cst_93 = arith.constant 5.000000e-01 : f32
    %474 = vector.broadcast %cst_93 : f32 to vector<2x96xf32>
    %475 = arith.mulf %474, %473 : vector<2x96xf32>
    %cst_94 = arith.constant 5.000000e-01 : f32
    %476 = vector.broadcast %cst_94 : f32 to vector<2x96xf32>
    %477 = arith.addf %475, %476 : vector<2x96xf32>
    %478 = vector.extract_strided_slice %469 {offsets = [0, 96], sizes = [2, 32], strides = [1, 1]} : vector<2x128xf32> to vector<2x32xf32>
    %479 = math.tanh %478 : vector<2x32xf32>
    %480 = vector.extract_strided_slice %477 {offsets = [0, 0], sizes = [2, 32], strides = [1, 1]} : vector<2x96xf32> to vector<2x32xf32>
    %481 = vector.extract_strided_slice %477 {offsets = [0, 32], sizes = [2, 32], strides = [1, 1]} : vector<2x96xf32> to vector<2x32xf32>
    %482 = vector.extract_strided_slice %477 {offsets = [0, 64], sizes = [2, 32], strides = [1, 1]} : vector<2x96xf32> to vector<2x32xf32>
    %483 = arith.mulf %481, %432 : vector<2x32xf32>
    %484 = arith.mulf %480, %479 : vector<2x32xf32>
    %485 = arith.addf %483, %484 : vector<2x32xf32>
    %486 = math.tanh %485 : vector<2x32xf32>
    %487 = arith.mulf %482, %486 : vector<2x32xf32>
    %488 = vector.broadcast %6 : vector<1x32xf32> to vector<2x32xf32>
    %489 = arith.mulf %487, %488 : vector<2x32xf32>
    %cst_95 = arith.constant dense<0.000000e+00> : vector<2xf32>
    %490 = vector.multi_reduction <add>, %489, %cst_95 [1] : vector<2x32xf32> to vector<2xf32>
    %491 = vector.shape_cast %490 : vector<2xf32> to vector<2x1xf32>
    %492 = vector.broadcast %7 : vector<1x1xf32> to vector<2x1xf32>
    %493 = arith.addf %491, %492 : vector<2x1xf32>
    %494 = vector.broadcast %493 : vector<2x1xf32> to vector<2x128xf32>
    %495 = vector.broadcast %1 : vector<1x128xf32> to vector<2x128xf32>
    %496 = arith.mulf %494, %495 : vector<2x128xf32>
    %cst_96 = arith.constant dense<0.000000e+00> : vector<2x128xf32>
    %497 = tpu.matmul %465, %2, %cst_96 {dimension_numbers = #tpu.dot_dimension_numbers<[1], [0], [0], [1], [0, 0, 1, 1], [], []>} : vector<2x32xf32>, vector<32x128xf32>, vector<2x128xf32> -> vector<2x128xf32>
    %498 = arith.addf %496, %497 : vector<2x128xf32>
    %499 = vector.broadcast %3 : vector<1x128xf32> to vector<2x128xf32>
    %500 = arith.addf %498, %499 : vector<2x128xf32>
    %501 = vector.extract_strided_slice %500 {offsets = [0, 0], sizes = [2, 96], strides = [1, 1]} : vector<2x128xf32> to vector<2x96xf32>
    %cst_97 = arith.constant 5.000000e-01 : f32
    %502 = vector.broadcast %cst_97 : f32 to vector<2x96xf32>
    %503 = arith.mulf %502, %501 : vector<2x96xf32>
    %504 = math.tanh %503 : vector<2x96xf32>
    %cst_98 = arith.constant 5.000000e-01 : f32
    %505 = vector.broadcast %cst_98 : f32 to vector<2x96xf32>
    %506 = arith.mulf %505, %504 : vector<2x96xf32>
    %cst_99 = arith.constant 5.000000e-01 : f32
    %507 = vector.broadcast %cst_99 : f32 to vector<2x96xf32>
    %508 = arith.addf %506, %507 : vector<2x96xf32>
    %509 = vector.extract_strided_slice %500 {offsets = [0, 96], sizes = [2, 32], strides = [1, 1]} : vector<2x128xf32> to vector<2x32xf32>
    %510 = math.tanh %509 : vector<2x32xf32>
    %511 = vector.extract_strided_slice %508 {offsets = [0, 0], sizes = [2, 32], strides = [1, 1]} : vector<2x96xf32> to vector<2x32xf32>
    %512 = vector.extract_strided_slice %508 {offsets = [0, 32], sizes = [2, 32], strides = [1, 1]} : vector<2x96xf32> to vector<2x32xf32>
    %513 = vector.extract_strided_slice %508 {offsets = [0, 64], sizes = [2, 32], strides = [1, 1]} : vector<2x96xf32> to vector<2x32xf32>
    %514 = arith.mulf %512, %463 : vector<2x32xf32>
    %515 = arith.mulf %511, %510 : vector<2x32xf32>
    %516 = arith.addf %514, %515 : vector<2x32xf32>
    %517 = math.tanh %516 : vector<2x32xf32>
    %518 = arith.mulf %513, %517 : vector<2x32xf32>
    %519 = tpu.concatenate %518, %487 in 1 : vector<2x32xf32>, vector<2x32xf32> -> vector<2x64xf32>
    %cst_100 = arith.constant dense<0.000000e+00> : vector<2x128xf32>
    %520 = tpu.matmul %519, %4, %cst_100 {dimension_numbers = #tpu.dot_dimension_numbers<[1], [0], [0], [1], [0, 0, 1, 1], [], []>} : vector<2x64xf32>, vector<64x128xf32>, vector<2x128xf32> -> vector<2x128xf32>
    %521 = vector.broadcast %5 : vector<1x128xf32> to vector<2x128xf32>
    %522 = arith.addf %520, %521 : vector<2x128xf32>
    %523 = vector.extract_strided_slice %522 {offsets = [0, 0], sizes = [2, 96], strides = [1, 1]} : vector<2x128xf32> to vector<2x96xf32>
    %cst_101 = arith.constant 5.000000e-01 : f32
    %524 = vector.broadcast %cst_101 : f32 to vector<2x96xf32>
    %525 = arith.mulf %524, %523 : vector<2x96xf32>
    %526 = math.tanh %525 : vector<2x96xf32>
    %cst_102 = arith.constant 5.000000e-01 : f32
    %527 = vector.broadcast %cst_102 : f32 to vector<2x96xf32>
    %528 = arith.mulf %527, %526 : vector<2x96xf32>
    %cst_103 = arith.constant 5.000000e-01 : f32
    %529 = vector.broadcast %cst_103 : f32 to vector<2x96xf32>
    %530 = arith.addf %528, %529 : vector<2x96xf32>
    %531 = vector.extract_strided_slice %522 {offsets = [0, 96], sizes = [2, 32], strides = [1, 1]} : vector<2x128xf32> to vector<2x32xf32>
    %532 = math.tanh %531 : vector<2x32xf32>
    %533 = vector.extract_strided_slice %530 {offsets = [0, 0], sizes = [2, 32], strides = [1, 1]} : vector<2x96xf32> to vector<2x32xf32>
    %534 = vector.extract_strided_slice %530 {offsets = [0, 32], sizes = [2, 32], strides = [1, 1]} : vector<2x96xf32> to vector<2x32xf32>
    %535 = vector.extract_strided_slice %530 {offsets = [0, 64], sizes = [2, 32], strides = [1, 1]} : vector<2x96xf32> to vector<2x32xf32>
    %536 = arith.mulf %534, %485 : vector<2x32xf32>
    %537 = arith.mulf %533, %532 : vector<2x32xf32>
    %538 = arith.addf %536, %537 : vector<2x32xf32>
    %539 = math.tanh %538 : vector<2x32xf32>
    %540 = arith.mulf %535, %539 : vector<2x32xf32>
    %541 = vector.broadcast %6 : vector<1x32xf32> to vector<2x32xf32>
    %542 = arith.mulf %540, %541 : vector<2x32xf32>
    %cst_104 = arith.constant dense<0.000000e+00> : vector<2xf32>
    %543 = vector.multi_reduction <add>, %542, %cst_104 [1] : vector<2x32xf32> to vector<2xf32>
    %544 = vector.shape_cast %543 : vector<2xf32> to vector<2x1xf32>
    %545 = vector.broadcast %7 : vector<1x1xf32> to vector<2x1xf32>
    %546 = arith.addf %544, %545 : vector<2x1xf32>
    %547 = vector.broadcast %546 : vector<2x1xf32> to vector<2x128xf32>
    %548 = vector.broadcast %1 : vector<1x128xf32> to vector<2x128xf32>
    %549 = arith.mulf %547, %548 : vector<2x128xf32>
    %cst_105 = arith.constant dense<0.000000e+00> : vector<2x128xf32>
    %550 = tpu.matmul %518, %2, %cst_105 {dimension_numbers = #tpu.dot_dimension_numbers<[1], [0], [0], [1], [0, 0, 1, 1], [], []>} : vector<2x32xf32>, vector<32x128xf32>, vector<2x128xf32> -> vector<2x128xf32>
    %551 = arith.addf %549, %550 : vector<2x128xf32>
    %552 = vector.broadcast %3 : vector<1x128xf32> to vector<2x128xf32>
    %553 = arith.addf %551, %552 : vector<2x128xf32>
    %554 = vector.extract_strided_slice %553 {offsets = [0, 0], sizes = [2, 96], strides = [1, 1]} : vector<2x128xf32> to vector<2x96xf32>
    %cst_106 = arith.constant 5.000000e-01 : f32
    %555 = vector.broadcast %cst_106 : f32 to vector<2x96xf32>
    %556 = arith.mulf %555, %554 : vector<2x96xf32>
    %557 = math.tanh %556 : vector<2x96xf32>
    %cst_107 = arith.constant 5.000000e-01 : f32
    %558 = vector.broadcast %cst_107 : f32 to vector<2x96xf32>
    %559 = arith.mulf %558, %557 : vector<2x96xf32>
    %cst_108 = arith.constant 5.000000e-01 : f32
    %560 = vector.broadcast %cst_108 : f32 to vector<2x96xf32>
    %561 = arith.addf %559, %560 : vector<2x96xf32>
    %562 = vector.extract_strided_slice %553 {offsets = [0, 96], sizes = [2, 32], strides = [1, 1]} : vector<2x128xf32> to vector<2x32xf32>
    %563 = math.tanh %562 : vector<2x32xf32>
    %564 = vector.extract_strided_slice %561 {offsets = [0, 0], sizes = [2, 32], strides = [1, 1]} : vector<2x96xf32> to vector<2x32xf32>
    %565 = vector.extract_strided_slice %561 {offsets = [0, 32], sizes = [2, 32], strides = [1, 1]} : vector<2x96xf32> to vector<2x32xf32>
    %566 = vector.extract_strided_slice %561 {offsets = [0, 64], sizes = [2, 32], strides = [1, 1]} : vector<2x96xf32> to vector<2x32xf32>
    %567 = arith.mulf %565, %516 : vector<2x32xf32>
    %568 = arith.mulf %564, %563 : vector<2x32xf32>
    %569 = arith.addf %567, %568 : vector<2x32xf32>
    %570 = math.tanh %569 : vector<2x32xf32>
    %571 = arith.mulf %566, %570 : vector<2x32xf32>
    %572 = tpu.concatenate %571, %540 in 1 : vector<2x32xf32>, vector<2x32xf32> -> vector<2x64xf32>
    %cst_109 = arith.constant dense<0.000000e+00> : vector<2x128xf32>
    %573 = tpu.matmul %572, %4, %cst_109 {dimension_numbers = #tpu.dot_dimension_numbers<[1], [0], [0], [1], [0, 0, 1, 1], [], []>} : vector<2x64xf32>, vector<64x128xf32>, vector<2x128xf32> -> vector<2x128xf32>
    %574 = vector.broadcast %5 : vector<1x128xf32> to vector<2x128xf32>
    %575 = arith.addf %573, %574 : vector<2x128xf32>
    %576 = vector.extract_strided_slice %575 {offsets = [0, 0], sizes = [2, 96], strides = [1, 1]} : vector<2x128xf32> to vector<2x96xf32>
    %cst_110 = arith.constant 5.000000e-01 : f32
    %577 = vector.broadcast %cst_110 : f32 to vector<2x96xf32>
    %578 = arith.mulf %577, %576 : vector<2x96xf32>
    %579 = math.tanh %578 : vector<2x96xf32>
    %cst_111 = arith.constant 5.000000e-01 : f32
    %580 = vector.broadcast %cst_111 : f32 to vector<2x96xf32>
    %581 = arith.mulf %580, %579 : vector<2x96xf32>
    %cst_112 = arith.constant 5.000000e-01 : f32
    %582 = vector.broadcast %cst_112 : f32 to vector<2x96xf32>
    %583 = arith.addf %581, %582 : vector<2x96xf32>
    %584 = vector.extract_strided_slice %575 {offsets = [0, 96], sizes = [2, 32], strides = [1, 1]} : vector<2x128xf32> to vector<2x32xf32>
    %585 = math.tanh %584 : vector<2x32xf32>
    %586 = vector.extract_strided_slice %583 {offsets = [0, 0], sizes = [2, 32], strides = [1, 1]} : vector<2x96xf32> to vector<2x32xf32>
    %587 = vector.extract_strided_slice %583 {offsets = [0, 32], sizes = [2, 32], strides = [1, 1]} : vector<2x96xf32> to vector<2x32xf32>
    %588 = vector.extract_strided_slice %583 {offsets = [0, 64], sizes = [2, 32], strides = [1, 1]} : vector<2x96xf32> to vector<2x32xf32>
    %589 = arith.mulf %587, %538 : vector<2x32xf32>
    %590 = arith.mulf %586, %585 : vector<2x32xf32>
    %591 = arith.addf %589, %590 : vector<2x32xf32>
    %592 = math.tanh %591 : vector<2x32xf32>
    %593 = arith.mulf %588, %592 : vector<2x32xf32>
    %594 = vector.broadcast %6 : vector<1x32xf32> to vector<2x32xf32>
    %595 = arith.mulf %593, %594 : vector<2x32xf32>
    %cst_113 = arith.constant dense<0.000000e+00> : vector<2xf32>
    %596 = vector.multi_reduction <add>, %595, %cst_113 [1] : vector<2x32xf32> to vector<2xf32>
    %597 = vector.shape_cast %596 : vector<2xf32> to vector<2x1xf32>
    %598 = vector.broadcast %7 : vector<1x1xf32> to vector<2x1xf32>
    %599 = arith.addf %597, %598 : vector<2x1xf32>
    %600 = vector.broadcast %599 : vector<2x1xf32> to vector<2x128xf32>
    %601 = vector.broadcast %1 : vector<1x128xf32> to vector<2x128xf32>
    %602 = arith.mulf %600, %601 : vector<2x128xf32>
    %cst_114 = arith.constant dense<0.000000e+00> : vector<2x128xf32>
    %603 = tpu.matmul %571, %2, %cst_114 {dimension_numbers = #tpu.dot_dimension_numbers<[1], [0], [0], [1], [0, 0, 1, 1], [], []>} : vector<2x32xf32>, vector<32x128xf32>, vector<2x128xf32> -> vector<2x128xf32>
    %604 = arith.addf %602, %603 : vector<2x128xf32>
    %605 = vector.broadcast %3 : vector<1x128xf32> to vector<2x128xf32>
    %606 = arith.addf %604, %605 : vector<2x128xf32>
    %607 = vector.extract_strided_slice %606 {offsets = [0, 0], sizes = [2, 96], strides = [1, 1]} : vector<2x128xf32> to vector<2x96xf32>
    %cst_115 = arith.constant 5.000000e-01 : f32
    %608 = vector.broadcast %cst_115 : f32 to vector<2x96xf32>
    %609 = arith.mulf %608, %607 : vector<2x96xf32>
    %610 = math.tanh %609 : vector<2x96xf32>
    %cst_116 = arith.constant 5.000000e-01 : f32
    %611 = vector.broadcast %cst_116 : f32 to vector<2x96xf32>
    %612 = arith.mulf %611, %610 : vector<2x96xf32>
    %cst_117 = arith.constant 5.000000e-01 : f32
    %613 = vector.broadcast %cst_117 : f32 to vector<2x96xf32>
    %614 = arith.addf %612, %613 : vector<2x96xf32>
    %615 = vector.extract_strided_slice %606 {offsets = [0, 96], sizes = [2, 32], strides = [1, 1]} : vector<2x128xf32> to vector<2x32xf32>
    %616 = math.tanh %615 : vector<2x32xf32>
    %617 = vector.extract_strided_slice %614 {offsets = [0, 0], sizes = [2, 32], strides = [1, 1]} : vector<2x96xf32> to vector<2x32xf32>
    %618 = vector.extract_strided_slice %614 {offsets = [0, 32], sizes = [2, 32], strides = [1, 1]} : vector<2x96xf32> to vector<2x32xf32>
    %619 = vector.extract_strided_slice %614 {offsets = [0, 64], sizes = [2, 32], strides = [1, 1]} : vector<2x96xf32> to vector<2x32xf32>
    %620 = arith.mulf %618, %569 : vector<2x32xf32>
    %621 = arith.mulf %617, %616 : vector<2x32xf32>
    %622 = arith.addf %620, %621 : vector<2x32xf32>
    %623 = math.tanh %622 : vector<2x32xf32>
    %624 = arith.mulf %619, %623 : vector<2x32xf32>
    %625 = tpu.concatenate %624, %593 in 1 : vector<2x32xf32>, vector<2x32xf32> -> vector<2x64xf32>
    %cst_118 = arith.constant dense<0.000000e+00> : vector<2x128xf32>
    %626 = tpu.matmul %625, %4, %cst_118 {dimension_numbers = #tpu.dot_dimension_numbers<[1], [0], [0], [1], [0, 0, 1, 1], [], []>} : vector<2x64xf32>, vector<64x128xf32>, vector<2x128xf32> -> vector<2x128xf32>
    %627 = vector.broadcast %5 : vector<1x128xf32> to vector<2x128xf32>
    %628 = arith.addf %626, %627 : vector<2x128xf32>
    %629 = vector.extract_strided_slice %628 {offsets = [0, 0], sizes = [2, 96], strides = [1, 1]} : vector<2x128xf32> to vector<2x96xf32>
    %cst_119 = arith.constant 5.000000e-01 : f32
    %630 = vector.broadcast %cst_119 : f32 to vector<2x96xf32>
    %631 = arith.mulf %630, %629 : vector<2x96xf32>
    %632 = math.tanh %631 : vector<2x96xf32>
    %cst_120 = arith.constant 5.000000e-01 : f32
    %633 = vector.broadcast %cst_120 : f32 to vector<2x96xf32>
    %634 = arith.mulf %633, %632 : vector<2x96xf32>
    %cst_121 = arith.constant 5.000000e-01 : f32
    %635 = vector.broadcast %cst_121 : f32 to vector<2x96xf32>
    %636 = arith.addf %634, %635 : vector<2x96xf32>
    %637 = vector.extract_strided_slice %628 {offsets = [0, 96], sizes = [2, 32], strides = [1, 1]} : vector<2x128xf32> to vector<2x32xf32>
    %638 = math.tanh %637 : vector<2x32xf32>
    %639 = vector.extract_strided_slice %636 {offsets = [0, 0], sizes = [2, 32], strides = [1, 1]} : vector<2x96xf32> to vector<2x32xf32>
    %640 = vector.extract_strided_slice %636 {offsets = [0, 32], sizes = [2, 32], strides = [1, 1]} : vector<2x96xf32> to vector<2x32xf32>
    %641 = vector.extract_strided_slice %636 {offsets = [0, 64], sizes = [2, 32], strides = [1, 1]} : vector<2x96xf32> to vector<2x32xf32>
    %642 = arith.mulf %640, %591 : vector<2x32xf32>
    %643 = arith.mulf %639, %638 : vector<2x32xf32>
    %644 = arith.addf %642, %643 : vector<2x32xf32>
    %645 = math.tanh %644 : vector<2x32xf32>
    %646 = arith.mulf %641, %645 : vector<2x32xf32>
    %647 = vector.broadcast %6 : vector<1x32xf32> to vector<2x32xf32>
    %648 = arith.mulf %646, %647 : vector<2x32xf32>
    %cst_122 = arith.constant dense<0.000000e+00> : vector<2xf32>
    %649 = vector.multi_reduction <add>, %648, %cst_122 [1] : vector<2x32xf32> to vector<2xf32>
    %650 = vector.shape_cast %649 : vector<2xf32> to vector<2x1xf32>
    %651 = vector.broadcast %7 : vector<1x1xf32> to vector<2x1xf32>
    %652 = arith.addf %650, %651 : vector<2x1xf32>
    %653 = tpu.concatenate %62, %116, %170, %224, %278, %332, %386, %440, %493, %546, %599, %652 in 1 : vector<2x1xf32>, vector<2x1xf32>, vector<2x1xf32>, vector<2x1xf32>, vector<2x1xf32>, vector<2x1xf32>, vector<2x1xf32>, vector<2x1xf32>, vector<2x1xf32>, vector<2x1xf32>, vector<2x1xf32>, vector<2x1xf32> -> vector<2x12xf32>
    %c0_123 = arith.constant 0 : index
    %c0_124 = arith.constant 0 : index
    %654 = vector.load %arg8[%c0_123, %c0_124] : memref<2x12xf32, #tpu.memory_space<vmem>>, vector<2x12xf32>
    tpu.vector_store %arg8[%c0_123, %c0_124], %653 {strides = array<i32>} : memref<2x12xf32, #tpu.memory_space<vmem>>, vector<2x12xf32>,
    return
  }
}

</mosaic_0001>

<bundles_post_ra>
// kernel: tpu_custom_call.1
= control target key start
LH: loop header
LB: loop body
LE: loop exit
PB: predicated region body
PF: predicated region fallthrough
CT: control target
= control target key end

     0   :  { %s4513_s0 = inlined_call_operand.vmem [shape: f32[2,8], index: 0, kind: input, shape index: {}]   ;;  %s4514_s1 = inlined_call_operand.vmem [shape: f32[1,128], index: 1, kind: input, shape index: {}]   ;;  %s4515_s2 = inlined_call_operand.hbm [shape: f32[32,128], index: 2, kind: input, shape index: {}]   ;;  %s4516_s3 = inlined_call_operand.vmem [shape: f32[1,128], index: 3, kind: input, shape index: {}]   ;;  %s4517_s4 = inlined_call_operand.hbm [shape: f32[64,128], index: 4, kind: input, shape index: {}]   ;;  %s4518_s5 = inlined_call_operand.vmem [shape: f32[1,128], index: 5, kind: input, shape index: {}]   ;;  %s4519_s6 = inlined_call_operand.vmem [shape: f32[1,32], index: 6, kind: input, shape index: {}]   ;;  %s4520_s7 = inlined_call_operand.<no memory space> [shape: f32[1,1], index: 7, kind: input, shape index: {}]   ;;  %s4521_s8 = inlined_call_operand.hbm [shape: f32[2,12], index: 8, kind: output, shape index: {}]  }
   0x1   :  { %v13_v0 = vstv %s4520_s7 }
   0x2   :  { %14 = vst [vmem:[#allocation2] sm:$0x1] %v13_v0 }
   0x3   :  { %15 = vsyncpa [#allocation4], 0 }
   0x4   :  { %16 = vsyncpa [#allocation7], 0 }
   0x5   :  { %17 = vsyncpa [#allocation5], 0  ;;  %s3793_s29 = smov [#allocation3]   ;;  %s3721_s11 = scalar_lea.hbm %s4515_s2, 512 }
   0x6   :  { %s27_s30 = sshll.u32 %s3793_s29, 4  ;;  %p3722_p0 = scmp.ne.s32.totalorder %s4515_s2, %s3721_s11  ;;  %s28_s30 = int_to_ptr.vmem [resolvable:$true] %s27_s30 }
   0x7   :  { %p3725_p1 = scmp.lt.u32.totalorder %s3721_s11, %s4515_s2 }
   0x9   :  { %p3727_p2 = pnand %p3725_p1, %p3722_p0 }
   0xb   :  { %3730 = shalt.err (!%p3727_p2)
}
   0xc   :  { %s3731_s7 = scalar_lea.vmem %s28_s30, 512  ;;  %p3736_p4 = scmp.lt.s32.totalorder %s28_s30, %s28_s30 }
   0xd   :  { %p3732_p3 = scmp.ne.s32.totalorder %s28_s30, %s3731_s7  ;;  %p3737_p5 = scmp.lt.s32.totalorder %s3731_s7, %s3731_s7 }
   0xf   :  { %p3738_p6 = por %p3737_p5, %p3736_p4 }
  0x11   :  { %p3739_p7 = pnand %p3738_p6, %p3732_p3 }
  0x13   :  { %3742 = shalt.err (!%p3739_p7)
}
  0x14   :  { %s3794_s16 = smov 128   ;;  %s3795_s17 = smov 8  }
  0x15   :  { %33 = dma.hbm_to_vmem [thread:$0]  %s4515_s2, 512, %s28_s30, [#allocation4], %s3794_s16, %s3794_s16, %s3795_s17  }
  0x16   :  { %s3796_s20 = smov [#allocation6]   ;;  %s3743_s24 = scalar_lea.hbm %s4517_s4, 1024 }
  0x17   :  { %s41_s21 = sshll.u32 %s3796_s20, 4  ;;  %p3744_p8 = scmp.ne.s32.totalorder %s4517_s4, %s3743_s24  ;;  %s42_s21 = int_to_ptr.vmem [resolvable:$true] %s41_s21 }
  0x18   :  { %p3747_p9 = scmp.lt.u32.totalorder %s3743_s24, %s4517_s4 }
  0x1a   :  { %p3749_p10 = pnand %p3747_p9, %p3744_p8 }
  0x1c   :  { %3752 = shalt.err (!%p3749_p10)
}
  0x1d   :  { %s3753_s29 = scalar_lea.vmem %s42_s21, 1024  ;;  %p3758_p12 = scmp.lt.s32.totalorder %s42_s21, %s42_s21 }
  0x1e   :  { %p3754_p11 = scmp.ne.s32.totalorder %s42_s21, %s3753_s29  ;;  %p3759_p13 = scmp.lt.s32.totalorder %s3753_s29, %s3753_s29 }
  0x20   :  { %p3760_p0 = por %p3759_p13, %p3758_p12 }
  0x22   :  { %p3761_p1 = pnand %p3760_p0, %p3754_p11 }
  0x24   :  { %3764 = shalt.err (!%p3761_p1)
}
  0x25   :  { %47 = dma.hbm_to_vmem [thread:$0]  %s4517_s4, 1024, %s42_s21, [#allocation7], %s3794_s16, %s3794_s16, %s3795_s17  }
  0x26   :  { %3787 = dma.done.wait [#allocation4], 512  }
  0x27   :  { %3788 = vsyncadd [#allocation4], 4294966784 }
  0x28   :  { %3789 = dma.done.wait [#allocation7], 1024  }
  0x29   :  { %3790 = vsyncadd [#allocation7], 4294966272  ;;  %v3797_v1 = vmov 0.0|0.0   ;;  %vm3798_vm0 = vmmov 0   ;;  %v3799_v2 = vmov 0.0   ;;  %v3800_v3 = vmov 0  }
  0x2a   :  { %3319 = vmatprep.subr.bf16.mxu1 %v3797_v1  ;;  %2967 = vmatprep.mubr.msk.f32.mxu1 %vm3798_vm0, %v3799_v2  ;;  %v62_v4 = vld [vmem:[#allocation3] sm:$0xff]  ;;  %v63_v5 = vld [vmem:[#allocation3 + $0x8] sm:$0xff]  ;;  %v64_v6 = vld [vmem:[#allocation3 + $0x10] sm:$0xff]  ;;  %s3801_s13 = smov 32   ;;  %v3802_v42 = vmov 1   ;;  %s3803_s14 = smov 64  }
  0x2b   :  { %3564 = vset.pattern.permute.xlu0 %v3800_v3  ;;  %3337 = vmatprep.subr.bf16.mxu0 %v3797_v1  ;;  %v3903_v7 = vpack.c.bf16 %v63_v5, %v62_v4  ;;  %v65_v8 = vld [vmem:[#allocation3 + $0x18] sm:$0xff]  ;;  %v67_v29 = vld [vmem:[#allocation6] sm:$0xff]  ;;  %v68_v30 = vld [vmem:[#allocation6 + $0x8] sm:$0xff]  ;;  %vm90_vm1 = vcmask 261120   ;;  %vm205_vm2 = vcmask 523264   ;;  %s3805_s16 = smov 96  }
  0x2c   :  { %2997 = vmatprep.mubr.msk.f32.mxu0 %vm3798_vm0, %v3799_v2  ;;  %v3908_v9 = vld [vmem:[%s4513_s0] sm:$0x3]  ;;  %v3912_v10 = vpack.c.bf16 %v65_v8, %v64_v6  ;;  %v69_v31 = vld [vmem:[#allocation6 + $0x10] sm:$0xff]  ;;  %v3941_v32 = vpack.c.bf16 %v68_v30, %v67_v29  ;;  %v72_v36 = vld [vmem:[#allocation6 + $0x28] sm:$0xff]  ;;  %3565 = vset.pattern.permute.xlu1 %v3802_v42  ;;  %vm314_vm3 = vcmask 254976   ;;  %s3812_s23 = smov 2  }
  0x2d   :  { %80 = vperm.xlu0 %3564, %v3908_v9   ;;  %3321 = vmatpush3.bf16.msra.mxu1 %v3903_v7  ;;  %v3927_v11 = vld [vmem:[%s4514_s1] ss:$0 sm:$0xff]  ;;  %v71_v35 = vld [vmem:[#allocation6 + $0x20] sm:$0xff]  ;;  %v73_v38 = vld [vmem:[#allocation6 + $0x30] sm:$0xff]  ;;  %s3813_s24 = smov 3   ;;  %s3814_s25 = smov 5  }
  0x2e   :  { %3339 = vmatpush3.bf16.msra.mxu0 %v3903_v7  ;;  %3322 = vmatprep.subr.bf16.mxu1 %v3797_v1  ;;  %v3933_v14 = vld [vmem:[%s4516_s3] ss:$0 sm:$0xff]  ;;  %v3948_v37 = vpack.c.bf16 %v72_v36, %v71_v35  ;;  %s3815_s26 = smov 7   ;;  %s3816_s27 = smov 9   ;;  %vm2723_vm4 = vcmask 7168   ;;  %vm2725_vm5 = vcmask 15360  }
  0x2f   :  { %3340 = vmatprep.subr.bf16.mxu0 %v3797_v1  ;;  %v70_v33 = vld [vmem:[#allocation6 + $0x18] sm:$0xff]  ;;  %s3817_s28 = smov 4   ;;  %s3818_s29 = smov 6   ;;  %vm2727_vm6 = vcmask 23552   ;;  %vm2729_vm7 = vcmask 31744   ;;  %vm2731_vm8 = vcmask 39936  }
  0x30   :  { %v3944_v34 = vpack.c.bf16 %v70_v33, %v69_v31  ;;  %v74_v39 = vld [vmem:[#allocation6 + $0x38] sm:$0xff]  ;;  %s3819_s2 = smov 11   ;;  %s3820_s30 = smov 10   ;;  %vm2733_vm9 = vcmask 48128   ;;  %vm2735_vm10 = vcmask 56320   ;;  %vm2737_vm11 = vcmask 64512  }
  0x31   :  { %3324 = vmatpush3.bf16.msra.mxu1 %v3912_v10  ;;  %v3953_v41 = vpack.c.bf16 %v74_v39, %v73_v38  ;;  %v3984_v49 = vld [vmem:[%s4518_s5] ss:$0 sm:$0xff]  ;;  %vm2739_vm12 = vcmask 72704   ;;  %vm2741_vm13 = vcmask 80896   ;;  %vm2743_vm14 = vcmask 89088  }
  0x32   :  { %3342 = vmatpush3.bf16.msra.mxu0 %v3912_v10  ;;  %3325 = vmatprep.subr.bf16.mxu1 %v3797_v1  ;;  %vm2745_vm15 = vcmask 91136  }
  0x33   :  { %3343 = vmatprep.subr.bf16.mxu0 %v3797_v1 }
  0x34   :  { %2968 = vmatmul.mubr.f32.vlgmr.msra.gmra.mrb[0].mxu1 %v3799_v2 }
  0x35   :  { %2986 = vmatprep.mubr.msk.f32.mxu1 %vm3798_vm0, %v3799_v2  ;;  %3327 = vmatpush3.bf16.msra.mxu1 %v3941_v32 }
  0x36   :  { %3328 = vmatprep.subr.bf16.mxu1 %v3797_v1 }
  0x39   :  { %3330 = vmatpush3.bf16.msra.mxu1 %v3944_v34 }
  0x3a   :  { %3331 = vmatprep.subr.bf16.mxu1 %v3797_v1 }
  0x3d   :  { %3333 = vmatpush3.bf16.msra.mxu1 %v3948_v37 }
  0x3e   :  { %3334 = vmatprep.subr.bf16.mxu1 %v3797_v1 }
  0x41   :  { %3336 = vmatpush3.bf16.msra.mxu1 %v3953_v41 }
  0x42   :  { %3355 = vmatprep.subr.bf16.mxu1 %v3797_v1 }
  0xac   :  { %v81_v12 = vpop.permute.xlu0 %80 }
  0xad   :  { %v89_v13 = vmul.f32 %v3927_v11, %v81_v12 }
 0x107   :  { %v160_v15 = vpop.f32.mrb[0].mxu1 }
 0x108   :  { %v164_v16 = vadd.f32 %v160_v15, %v89_v13  ;;  %v2969_v17 = vpop.f32.mrb[1].mxu1 }
 0x10a   :  { %v171_v18 = vadd.f32 %v3933_v14, %v164_v16 }
 0x10c   :  { %3574 = vtanh.f32 %v171_v18  ;;  %v172_v20 = vmul.f32 0.5, %v171_v18 }
 0x10e   :  { %3576 = vtanh.f32 %v172_v20 }
 0x116   :  { %v3575_v19 = vpop.eup %3574 }
 0x117   :  { %179 = vrot.lane.b32.xlu0 %v3575_v19, %s3801_s13 }
 0x118   :  { %v3577_v21 = vpop.eup %3576 }
 0x119   :  { %v174_v22 = vmul.f32 0.5, %v3577_v21 }
 0x11b   :  { %v175_v23 = vadd.f32 0.5, %v174_v22 }
 0x11d   :  { %v177_v26 = vmul.f32 0.0, %v175_v23 }
 0x189   :  { %v180_v24 = vpop.permute.xlu0 %179 }
 0x18a   :  { %v182_v25 = vmul.f32 %v180_v24, %v175_v23 }
 0x18c   :  { %184 = vrot.lane.b32.xlu1 %v182_v25, %s3801_s13 }
 0x1fe   :  { %v185_v27 = vpop.permute.xlu1 %184 }
 0x1ff   :  { %v3938_v28 = vadd.f32 %v185_v27, %v177_v26 }
 0x201   :  { %3578 = vtanh.f32 %v3938_v28 }
 0x20b   :  { %v3579_v40 = vpop.eup %3578 }
 0x20c   :  { %190 = vrot.lane.b32.xlu1 %v3579_v40, %s3801_s13 }
 0x210   :  { %326 = vperm.xlu1 %3565, %v3908_v9  }
 0x214   :  { %3573 = vset.pattern.permute.xlu1 %v3800_v3 }
 0x27e   :  { %v191_v43 = vpop.permute.xlu1 %190 }
 0x27f   :  { %v193_v44 = vmul.f32 %v191_v43, %v175_v23  ;;  %v3804_v23 = vmov 2  }
 0x280   :  { %3566 = vset.pattern.permute.xlu0 %v3804_v23 }
 0x281   :  { %195 = vrot.lane.b32.xlu0 %v193_v44, %s3803_s14 }
 0x28f   :  { %v327_v47 = vpop.permute.xlu1 %326 }
 0x290   :  { %v329_v48 = vmul.f32 %v3927_v11, %v327_v47 }
 0x2f3   :  { %v196_v45 = vpop.permute.xlu0 %195 }
 0x2f4   :  { %v198_v46 = vsel %vm90_vm1, %v196_v45, 0.0  ;;  %2998 = vmatmul.mubr.msk.f32.vlgmr.msra.gmra.mrb[0].mxu0 %vm90_vm1, %v196_v45 }
 0x2f5   :  { %2987 = vmatmul.mubr.msk.f32.vlgmr.msra.gmra.mrb[2].mxu1 %vm205_vm2, %v198_v46  ;;  %3345 = vmatpush3.bf16.msra.mxu0 %v3941_v32 }
 0x2f6   :  { %3346 = vmatprep.subr.bf16.mxu0 %v3797_v1  ;;  %3357 = vmatpush3.bf16.msra.mxu1 %v3903_v7 }
 0x2f7   :  { %3358 = vmatprep.subr.bf16.mxu1 %v3797_v1  ;;  %3027 = vmatprep.mubr.msk.f32.mxu1 %vm3798_vm0, %v3799_v2 }
 0x2f8   :  { %3016 = vmatprep.mubr.msk.f32.mxu0 %vm3798_vm0, %v3799_v2 }
 0x2f9   :  { %3348 = vmatpush3.bf16.msra.mxu0 %v3944_v34 }
 0x2fa   :  { %3349 = vmatprep.subr.bf16.mxu0 %v3797_v1  ;;  %3360 = vmatpush3.bf16.msra.mxu1 %v3912_v10 }
 0x2fb   :  { %3361 = vmatprep.subr.bf16.mxu1 %v3797_v1 }
 0x2fd   :  { %3351 = vmatpush3.bf16.msra.mxu0 %v3948_v37 }
 0x2fe   :  { %3352 = vmatprep.subr.bf16.mxu0 %v3797_v1 }
 0x301   :  { %3354 = vmatpush3.bf16.msra.mxu0 %v3953_v41 }
 0x302   :  { %3373 = vmatprep.subr.bf16.mxu0 %v3797_v1 }
 0x3c7   :  { %v398_v50 = vpop.f32.mrb[0].mxu0 }
 0x3c8   :  { %v402_v51 = vadd.f32 %v398_v50, %v329_v48  ;;  %v275_v52 = vpop.f32.mrb[2].mxu1  ;;  %v2999_v53 = vpop.f32.mrb[1].mxu0 }
 0x3c9   :  { %v276_v54 = vadd.f32 %v3984_v49, %v275_v52  ;;  %v2988_v55 = vpop.f32.mrb[3].mxu1 }
 0x3ca   :  { %v403_v56 = vadd.f32 %v3933_v14, %v402_v51 }
 0x3cb   :  { %3580 = vtanh.f32 %v276_v54  ;;  %v279_v59 = vmul.f32 0.5, %v276_v54 }
 0x3cc   :  { %3582 = vtanh.f32 %v403_v56  ;;  %v404_v60 = vmul.f32 0.5, %v403_v56 }
 0x3cd   :  { %3584 = vtanh.f32 %v279_v59 }
 0x3ce   :  { %3586 = vtanh.f32 %v404_v60 }
 0x3d5   :  { %v3581_v57 = vpop.eup %3580 }
 0x3d6   :  { %v3583_v58 = vpop.eup %3582  ;;  %286 = vrot.lane.b32.xlu1 %v3581_v57, %s3801_s13 }
 0x3d7   :  { %411 = vrot.lane.b32.xlu0 %v3583_v58, %s3801_s13  ;;  %v3585_v61 = vpop.eup %3584 }
 0x3d8   :  { %v3587_v62 = vpop.eup %3586  ;;  %v281_v63 = vmul.f32 0.5, %v3585_v61 }
 0x3d9   :  { %v406_v0 = vmul.f32 0.5, %v3587_v62 }
 0x3da   :  { %v282_v4 = vadd.f32 0.5, %v281_v63 }
 0x3db   :  { %v407_v6 = vadd.f32 0.5, %v406_v0 }
 0x3dc   :  { %v284_v15 = vmul.f32 0.0, %v282_v4 }
 0x3dd   :  { %v409_v17 = vmul.f32 %v407_v6, %v3938_v28 }
 0x448   :  { %v287_v5 = vpop.permute.xlu1 %286 }
 0x449   :  { %v289_v8 = vmul.f32 %v287_v5, %v282_v4  ;;  %v412_v12 = vpop.permute.xlu0 %411 }
 0x44a   :  { %v414_v13 = vmul.f32 %v412_v12, %v407_v6 }
 0x44b   :  { %291 = vrot.lane.b32.xlu1 %v289_v8, %s3801_s13 }
 0x44c   :  { %416 = vrot.lane.b32.xlu0 %v414_v13, %s3801_s13 }
 0x4bd   :  { %v292_v16 = vpop.permute.xlu1 %291 }
 0x4be   :  { %v3993_v18 = vadd.f32 %v292_v16, %v284_v15  ;;  %v417_v19 = vpop.permute.xlu0 %416 }
 0x4bf   :  { %v3995_v20 = vadd.f32 %v417_v19, %v409_v17 }
 0x4c0   :  { %3588 = vtanh.f32 %v3993_v18 }
 0x4c1   :  { %3590 = vtanh.f32 %v3995_v20 }
 0x4ca   :  { %v3589_v21 = vpop.eup %3588 }
 0x4cb   :  { %v3591_v22 = vpop.eup %3590  ;;  %297 = vrot.lane.b32.xlu1 %v3589_v21, %s3801_s13 }
 0x4cc   :  { %422 = vrot.lane.b32.xlu0 %v3591_v22, %s3801_s13 }
 0x53d   :  { %v298_v24 = vpop.permute.xlu1 %297 }
 0x53e   :  { %v4001_v25 = vmul.f32 %v298_v24, %v282_v4  ;;  %v423_v26 = vpop.permute.xlu0 %422 }
 0x53f   :  { %v425_v27 = vmul.f32 %v423_v26, %v407_v6  ;;  %v3806_v6 = vmov 3  }
 0x540   :  { %431 = vrot.lane.b32.xlu1 %v4001_v25, %s3805_s16 }
 0x541   :  { %427 = vrot.lane.b32.xlu0 %v425_v27, %s3803_s14 }
 0x545   :  { %540 = vperm.xlu0 %3566, %v3908_v9  }
 0x549   :  { %3567 = vset.pattern.permute.xlu0 %v3806_v6 }
 0x5b2   :  { %v432_v28 = vpop.permute.xlu1 %431 }
 0x5b3   :  { %v428_v29 = vpop.permute.xlu0 %427 }
 0x5b4   :  { %v434_v30 = vsel %vm90_vm1, %v428_v29, %v432_v28  ;;  %3028 = vmatmul.mubr.msk.f32.vlgmr.msra.gmra.mrb[4].mxu1 %vm90_vm1, %v428_v29 }
 0x5b5   :  { %3017 = vmatmul.mubr.msk.f32.vlgmr.msra.gmra.mrb[2].mxu0 %vm205_vm2, %v434_v30  ;;  %3363 = vmatpush3.bf16.msra.mxu1 %v3941_v32 }
 0x5b6   :  { %3364 = vmatprep.subr.bf16.mxu1 %v3797_v1  ;;  %3375 = vmatpush3.bf16.msra.mxu0 %v3903_v7 }
 0x5b7   :  { %3376 = vmatprep.subr.bf16.mxu0 %v3797_v1  ;;  %3057 = vmatprep.mubr.msk.f32.mxu0 %vm3798_vm0, %v3799_v2 }
 0x5b8   :  { %3046 = vmatprep.mubr.msk.f32.mxu1 %vm3798_vm0, %v3799_v2 }
 0x5b9   :  { %3366 = vmatpush3.bf16.msra.mxu1 %v3944_v34 }
 0x5ba   :  { %3367 = vmatprep.subr.bf16.mxu1 %v3797_v1  ;;  %3378 = vmatpush3.bf16.msra.mxu0 %v3912_v10 }
 0x5bb   :  { %3379 = vmatprep.subr.bf16.mxu0 %v3797_v1 }
 0x5bd   :  { %3369 = vmatpush3.bf16.msra.mxu1 %v3948_v37 }
 0x5be   :  { %3370 = vmatprep.subr.bf16.mxu1 %v3797_v1 }
 0x5c1   :  { %3372 = vmatpush3.bf16.msra.mxu1 %v3953_v41 }
 0x5c2   :  { %3391 = vmatprep.subr.bf16.mxu1 %v3797_v1 }
 0x5c4   :  { %v541_v31 = vpop.permute.xlu0 %540 }
 0x5c5   :  { %v543_v33 = vmul.f32 %v3927_v11, %v541_v31 }
 0x687   :  { %v612_v35 = vpop.f32.mrb[4].mxu1 }
 0x688   :  { %v616_v36 = vadd.f32 %v612_v35, %v543_v33  ;;  %v504_v38 = vpop.f32.mrb[2].mxu0  ;;  %v3029_v39 = vpop.f32.mrb[5].mxu1 }
 0x689   :  { %v3018_v40 = vpop.f32.mrb[3].mxu0  ;;  %v505_v43 = vadd.f32 %v3984_v49, %v504_v38 }
 0x68a   :  { %v617_v42 = vadd.f32 %v3933_v14, %v616_v36 }
 0x68b   :  { %v508_v47 = vmul.f32 0.5, %v505_v43 }
 0x68c   :  { %3592 = vtanh.f32 %v617_v42  ;;  %v618_v46 = vmul.f32 0.5, %v617_v42 }
 0x68d   :  { %3594 = vtanh.f32 %v505_v43 }
 0x68e   :  { %3596 = vtanh.f32 %v618_v46 }
 0x68f   :  { %3598 = vtanh.f32 %v508_v47 }
 0x696   :  { %v3593_v44 = vpop.eup %3592 }
 0x697   :  { %625 = vrot.lane.b32.xlu1 %v3593_v44, %s3801_s13  ;;  %v3595_v45 = vpop.eup %3594 }
 0x698   :  { %v3597_v48 = vpop.eup %3596 }
 0x699   :  { %v620_v50 = vmul.f32 0.5, %v3597_v48  ;;  %v3599_v51 = vpop.eup %3598 }
 0x69a   :  { %v510_v52 = vmul.f32 0.5, %v3599_v51 }
 0x69b   :  { %515 = vrot.lane.b32.xlu1 %v3595_v45, %s3801_s13  ;;  %v621_v53 = vadd.f32 0.5, %v620_v50 }
 0x69c   :  { %v511_v56 = vadd.f32 0.5, %v510_v52 }
 0x69d   :  { %v623_v59 = vmul.f32 %v621_v53, %v3995_v20 }
 0x69e   :  { %v513_v62 = vmul.f32 %v511_v56, %v3993_v18 }
 0x709   :  { %v626_v54 = vpop.permute.xlu1 %625 }
 0x70a   :  { %v628_v55 = vmul.f32 %v626_v54, %v621_v53 }
 0x70c   :  { %630 = vrot.lane.b32.xlu0 %v628_v55, %s3801_s13 }
 0x70d   :  { %v516_v57 = vpop.permute.xlu1 %515 }
 0x70e   :  { %v518_v58 = vmul.f32 %v516_v57, %v511_v56 }
 0x710   :  { %520 = vrot.lane.b32.xlu1 %v518_v58, %s3801_s13 }
 0x77e   :  { %v631_v60 = vpop.permute.xlu0 %630 }
 0x77f   :  { %v4034_v61 = vadd.f32 %v631_v60, %v623_v59 }
 0x781   :  { %3600 = vtanh.f32 %v4034_v61 }
 0x782   :  { %v521_v63 = vpop.permute.xlu1 %520 }
 0x783   :  { %v4038_v0 = vadd.f32 %v521_v63, %v513_v62 }
 0x785   :  { %3602 = vtanh.f32 %v4038_v0 }
 0x78b   :  { %v3601_v4 = vpop.eup %3600 }
 0x78c   :  { %636 = vrot.lane.b32.xlu0 %v3601_v4, %s3801_s13 }
 0x78f   :  { %v3603_v5 = vpop.eup %3602 }
 0x790   :  { %526 = vrot.lane.b32.xlu1 %v3603_v5, %s3801_s13 }
 0x7fe   :  { %v637_v8 = vpop.permute.xlu0 %636 }
 0x7ff   :  { %v639_v12 = vmul.f32 %v637_v8, %v621_v53 }
 0x801   :  { %641 = vrot.lane.b32.xlu0 %v639_v12, %s3803_s14 }
 0x802   :  { %v527_v13 = vpop.permute.xlu1 %526 }
 0x803   :  { %v4044_v15 = vmul.f32 %v527_v13, %v511_v56  ;;  %v3807_v56 = vmov 4  }
 0x805   :  { %645 = vrot.lane.b32.xlu1 %v4044_v15, %s3805_s16  ;;  %754 = vperm.xlu0 %3567, %v3908_v9  }
 0x809   :  { %3568 = vset.pattern.permute.xlu0 %v3807_v56 }
 0x873   :  { %v642_v16 = vpop.permute.xlu0 %641 }
 0x874   :  { %3058 = vmatmul.mubr.msk.f32.vlgmr.msra.gmra.mrb[4].mxu0 %vm90_vm1, %v642_v16 }
 0x875   :  { %3381 = vmatpush3.bf16.msra.mxu0 %v3941_v32  ;;  %3076 = vmatprep.mubr.msk.f32.mxu0 %vm3798_vm0, %v3799_v2 }
 0x876   :  { %3382 = vmatprep.subr.bf16.mxu0 %v3797_v1 }
 0x877   :  { %v646_v17 = vpop.permute.xlu1 %645 }
 0x878   :  { %v648_v18 = vsel %vm90_vm1, %v642_v16, %v646_v17 }
 0x879   :  { %3047 = vmatmul.mubr.msk.f32.vlgmr.msra.gmra.mrb[6].mxu1 %vm205_vm2, %v648_v18  ;;  %3384 = vmatpush3.bf16.msra.mxu0 %v3944_v34 }
 0x87a   :  { %3393 = vmatpush3.bf16.msra.mxu1 %v3903_v7  ;;  %3385 = vmatprep.subr.bf16.mxu0 %v3797_v1 }
 0x87b   :  { %3394 = vmatprep.subr.bf16.mxu1 %v3797_v1  ;;  %3087 = vmatprep.mubr.msk.f32.mxu1 %vm3798_vm0, %v3799_v2 }
 0x87d   :  { %3387 = vmatpush3.bf16.msra.mxu0 %v3948_v37 }
 0x87e   :  { %3396 = vmatpush3.bf16.msra.mxu1 %v3912_v10  ;;  %3388 = vmatprep.subr.bf16.mxu0 %v3797_v1 }
 0x87f   :  { %3397 = vmatprep.subr.bf16.mxu1 %v3797_v1 }
 0x881   :  { %3390 = vmatpush3.bf16.msra.mxu0 %v3953_v41 }
 0x882   :  { %3409 = vmatprep.subr.bf16.mxu0 %v3797_v1 }
 0x884   :  { %v755_v19 = vpop.permute.xlu0 %754 }
 0x885   :  { %v757_v20 = vmul.f32 %v3927_v11, %v755_v19 }
 0x947   :  { %v826_v21 = vpop.f32.mrb[4].mxu0 }
 0x948   :  { %v830_v22 = vadd.f32 %v826_v21, %v757_v20  ;;  %v3059_v23 = vpop.f32.mrb[5].mxu0 }
 0x94a   :  { %v831_v24 = vadd.f32 %v3933_v14, %v830_v22 }
 0x94c   :  { %3604 = vtanh.f32 %v831_v24  ;;  %v718_v26 = vpop.f32.mrb[6].mxu1  ;;  %v832_v31 = vmul.f32 0.5, %v831_v24 }
 0x94d   :  { %v719_v27 = vadd.f32 %v3984_v49, %v718_v26  ;;  %v3048_v28 = vpop.f32.mrb[7].mxu1 }
 0x94f   :  { %3606 = vtanh.f32 %v719_v27  ;;  %v722_v33 = vmul.f32 0.5, %v719_v27 }
 0x950   :  { %3608 = vtanh.f32 %v832_v31 }
 0x951   :  { %3610 = vtanh.f32 %v722_v33 }
 0x956   :  { %v3605_v29 = vpop.eup %3604 }
 0x957   :  { %839 = vrot.lane.b32.xlu1 %v3605_v29, %s3801_s13 }
 0x959   :  { %v3607_v30 = vpop.eup %3606 }
 0x95a   :  { %v3609_v35 = vpop.eup %3608 }
 0x95b   :  { %729 = vrot.lane.b32.xlu1 %v3607_v30, %s3801_s13  ;;  %v834_v36 = vmul.f32 0.5, %v3609_v35  ;;  %v3611_v38 = vpop.eup %3610 }
 0x95c   :  { %v724_v39 = vmul.f32 0.5, %v3611_v38 }
 0x95d   :  { %v835_v40 = vadd.f32 0.5, %v834_v36 }
 0x95e   :  { %v725_v44 = vadd.f32 0.5, %v724_v39 }
 0x95f   :  { %v837_v47 = vmul.f32 %v835_v40, %v4034_v61 }
 0x960   :  { %v727_v51 = vmul.f32 %v725_v44, %v4038_v0 }
 0x9c9   :  { %v840_v42 = vpop.permute.xlu1 %839 }
 0x9ca   :  { %v842_v43 = vmul.f32 %v840_v42, %v835_v40 }
 0x9cc   :  { %844 = vrot.lane.b32.xlu0 %v842_v43, %s3801_s13 }
 0x9cd   :  { %v730_v45 = vpop.permute.xlu1 %729 }
 0x9ce   :  { %v732_v46 = vmul.f32 %v730_v45, %v725_v44  ;;  %v3808_v45 = vmov 5  }
 0x9d0   :  { %734 = vrot.lane.b32.xlu1 %v732_v46, %s3801_s13 }
 0xa3e   :  { %v845_v48 = vpop.permute.xlu0 %844 }
 0xa3f   :  { %v4076_v50 = vadd.f32 %v845_v48, %v837_v47 }
 0xa41   :  { %3612 = vtanh.f32 %v4076_v50 }
 0xa42   :  { %v735_v52 = vpop.permute.xlu1 %734 }
 0xa43   :  { %v4080_v53 = vadd.f32 %v735_v52, %v727_v51 }
 0xa45   :  { %3614 = vtanh.f32 %v4080_v53 }
 0xa4b   :  { %v3613_v54 = vpop.eup %3612 }
 0xa4c   :  { %850 = vrot.lane.b32.xlu0 %v3613_v54, %s3801_s13 }
 0xa4f   :  { %v3615_v55 = vpop.eup %3614 }
 0xa50   :  { %740 = vrot.lane.b32.xlu1 %v3615_v55, %s3801_s13 }
 0xabe   :  { %v851_v57 = vpop.permute.xlu0 %850 }
 0xabf   :  { %v853_v58 = vmul.f32 %v851_v57, %v835_v40 }
 0xac1   :  { %855 = vrot.lane.b32.xlu0 %v853_v58, %s3803_s14 }
 0xac2   :  { %v741_v59 = vpop.permute.xlu1 %740 }
 0xac3   :  { %v4086_v60 = vmul.f32 %v741_v59, %v725_v44 }
 0xac5   :  { %859 = vrot.lane.b32.xlu1 %v4086_v60, %s3805_s16  ;;  %968 = vperm.xlu0 %3568, %v3908_v9  }
 0xac9   :  { %3569 = vset.pattern.permute.xlu0 %v3808_v45 }
 0xb33   :  { %v856_v61 = vpop.permute.xlu0 %855 }
 0xb34   :  { %3088 = vmatmul.mubr.msk.f32.vlgmr.msra.gmra.mrb[8].mxu1 %vm90_vm1, %v856_v61 }
 0xb35   :  { %3399 = vmatpush3.bf16.msra.mxu1 %v3941_v32  ;;  %3106 = vmatprep.mubr.msk.f32.mxu1 %vm3798_vm0, %v3799_v2 }
 0xb36   :  { %3400 = vmatprep.subr.bf16.mxu1 %v3797_v1 }
 0xb37   :  { %v860_v62 = vpop.permute.xlu1 %859 }
 0xb38   :  { %v862_v63 = vsel %vm90_vm1, %v856_v61, %v860_v62 }
 0xb39   :  { %3077 = vmatmul.mubr.msk.f32.vlgmr.msra.gmra.mrb[6].mxu0 %vm205_vm2, %v862_v63  ;;  %3402 = vmatpush3.bf16.msra.mxu1 %v3944_v34 }
 0xb3a   :  { %3411 = vmatpush3.bf16.msra.mxu0 %v3903_v7  ;;  %3403 = vmatprep.subr.bf16.mxu1 %v3797_v1 }
 0xb3b   :  { %3412 = vmatprep.subr.bf16.mxu0 %v3797_v1  ;;  %3117 = vmatprep.mubr.msk.f32.mxu0 %vm3798_vm0, %v3799_v2 }
 0xb3d   :  { %3405 = vmatpush3.bf16.msra.mxu1 %v3948_v37 }
 0xb3e   :  { %3414 = vmatpush3.bf16.msra.mxu0 %v3912_v10  ;;  %3406 = vmatprep.subr.bf16.mxu1 %v3797_v1 }
 0xb3f   :  { %3415 = vmatprep.subr.bf16.mxu0 %v3797_v1 }
 0xb41   :  { %3408 = vmatpush3.bf16.msra.mxu1 %v3953_v41 }
 0xb42   :  { %3427 = vmatprep.subr.bf16.mxu1 %v3797_v1 }
 0xb44   :  { %v969_v0 = vpop.permute.xlu0 %968 }
 0xb45   :  { %v971_v4 = vmul.f32 %v3927_v11, %v969_v0 }
 0xc07   :  { %v1040_v5 = vpop.f32.mrb[8].mxu1 }
 0xc08   :  { %v1044_v6 = vadd.f32 %v1040_v5, %v971_v4  ;;  %v3089_v8 = vpop.f32.mrb[9].mxu1 }
 0xc0a   :  { %v1045_v12 = vadd.f32 %v3933_v14, %v1044_v6 }
 0xc0c   :  { %3616 = vtanh.f32 %v1045_v12  ;;  %v932_v13 = vpop.f32.mrb[6].mxu0  ;;  %v1046_v20 = vmul.f32 0.5, %v1045_v12 }
 0xc0d   :  { %v933_v16 = vadd.f32 %v3984_v49, %v932_v13  ;;  %v3078_v17 = vpop.f32.mrb[7].mxu0 }
 0xc0f   :  { %3618 = vtanh.f32 %v933_v16  ;;  %v936_v21 = vmul.f32 0.5, %v933_v16 }
 0xc10   :  { %3620 = vtanh.f32 %v1046_v20 }
 0xc11   :  { %3622 = vtanh.f32 %v936_v21 }
 0xc16   :  { %v3617_v18 = vpop.eup %3616 }
 0xc17   :  { %1053 = vrot.lane.b32.xlu1 %v3617_v18, %s3801_s13 }
 0xc19   :  { %v3619_v19 = vpop.eup %3618 }
 0xc1a   :  { %v3621_v22 = vpop.eup %3620 }
 0xc1b   :  { %943 = vrot.lane.b32.xlu1 %v3619_v19, %s3801_s13  ;;  %v1048_v23 = vmul.f32 0.5, %v3621_v22  ;;  %v3623_v24 = vpop.eup %3622 }
 0xc1c   :  { %v938_v26 = vmul.f32 0.5, %v3623_v24 }
 0xc1d   :  { %v1049_v27 = vadd.f32 0.5, %v1048_v23 }
 0xc1e   :  { %v939_v30 = vadd.f32 0.5, %v938_v26 }
 0xc1f   :  { %v1051_v35 = vmul.f32 %v1049_v27, %v4076_v50 }
 0xc20   :  { %v941_v39 = vmul.f32 %v939_v30, %v4080_v53 }
 0xc89   :  { %v1054_v28 = vpop.permute.xlu1 %1053 }
 0xc8a   :  { %v1056_v29 = vmul.f32 %v1054_v28, %v1049_v27 }
 0xc8c   :  { %1058 = vrot.lane.b32.xlu0 %v1056_v29, %s3801_s13 }
 0xc8d   :  { %v944_v31 = vpop.permute.xlu1 %943 }
 0xc8e   :  { %v946_v33 = vmul.f32 %v944_v31, %v939_v30 }
 0xc90   :  { %948 = vrot.lane.b32.xlu1 %v946_v33, %s3801_s13  ;;  %v3809_v33 = vmov 6  }
 0xcfe   :  { %v1059_v36 = vpop.permute.xlu0 %1058 }
 0xcff   :  { %v4118_v38 = vadd.f32 %v1059_v36, %v1051_v35 }
 0xd01   :  { %3624 = vtanh.f32 %v4118_v38 }
 0xd02   :  { %v949_v40 = vpop.permute.xlu1 %948 }
 0xd03   :  { %v4122_v42 = vadd.f32 %v949_v40, %v941_v39 }
 0xd05   :  { %3626 = vtanh.f32 %v4122_v42 }
 0xd0b   :  { %v3625_v43 = vpop.eup %3624 }
 0xd0c   :  { %1064 = vrot.lane.b32.xlu0 %v3625_v43, %s3801_s13 }
 0xd0f   :  { %v3627_v44 = vpop.eup %3626 }
 0xd10   :  { %954 = vrot.lane.b32.xlu1 %v3627_v44, %s3801_s13 }
 0xd7e   :  { %v1065_v46 = vpop.permute.xlu0 %1064 }
 0xd7f   :  { %v1067_v47 = vmul.f32 %v1065_v46, %v1049_v27 }
 0xd81   :  { %1069 = vrot.lane.b32.xlu0 %v1067_v47, %s3803_s14 }
 0xd82   :  { %v955_v48 = vpop.permute.xlu1 %954 }
 0xd83   :  { %v4128_v50 = vmul.f32 %v955_v48, %v939_v30 }
 0xd85   :  { %1073 = vrot.lane.b32.xlu1 %v4128_v50, %s3805_s16  ;;  %1182 = vperm.xlu0 %3569, %v3908_v9  }
 0xd89   :  { %3570 = vset.pattern.permute.xlu0 %v3809_v33 }
 0xdf3   :  { %v1070_v51 = vpop.permute.xlu0 %1069 }
 0xdf4   :  { %3118 = vmatmul.mubr.msk.f32.vlgmr.msra.gmra.mrb[8].mxu0 %vm90_vm1, %v1070_v51 }
 0xdf5   :  { %3417 = vmatpush3.bf16.msra.mxu0 %v3941_v32  ;;  %3136 = vmatprep.mubr.msk.f32.mxu0 %vm3798_vm0, %v3799_v2 }
 0xdf6   :  { %3418 = vmatprep.subr.bf16.mxu0 %v3797_v1 }
 0xdf7   :  { %v1074_v52 = vpop.permute.xlu1 %1073 }
 0xdf8   :  { %v1076_v53 = vsel %vm90_vm1, %v1070_v51, %v1074_v52 }
 0xdf9   :  { %3107 = vmatmul.mubr.msk.f32.vlgmr.msra.gmra.mrb[10].mxu1 %vm205_vm2, %v1076_v53  ;;  %3420 = vmatpush3.bf16.msra.mxu0 %v3944_v34 }
 0xdfa   :  { %3429 = vmatpush3.bf16.msra.mxu1 %v3903_v7  ;;  %3421 = vmatprep.subr.bf16.mxu0 %v3797_v1 }
 0xdfb   :  { %3430 = vmatprep.subr.bf16.mxu1 %v3797_v1  ;;  %3147 = vmatprep.mubr.msk.f32.mxu1 %vm3798_vm0, %v3799_v2 }
 0xdfd   :  { %3423 = vmatpush3.bf16.msra.mxu0 %v3948_v37 }
 0xdfe   :  { %3432 = vmatpush3.bf16.msra.mxu1 %v3912_v10  ;;  %3424 = vmatprep.subr.bf16.mxu0 %v3797_v1 }
 0xdff   :  { %3433 = vmatprep.subr.bf16.mxu1 %v3797_v1 }
 0xe01   :  { %3426 = vmatpush3.bf16.msra.mxu0 %v3953_v41 }
 0xe02   :  { %3445 = vmatprep.subr.bf16.mxu0 %v3797_v1 }
 0xe04   :  { %v1183_v54 = vpop.permute.xlu0 %1182 }
 0xe05   :  { %v1185_v55 = vmul.f32 %v3927_v11, %v1183_v54 }
 0xec7   :  { %v1254_v56 = vpop.f32.mrb[8].mxu0 }
 0xec8   :  { %v1258_v57 = vadd.f32 %v1254_v56, %v1185_v55  ;;  %v3119_v58 = vpop.f32.mrb[9].mxu0 }
 0xeca   :  { %v1259_v59 = vadd.f32 %v3933_v14, %v1258_v57 }
 0xecc   :  { %3628 = vtanh.f32 %v1259_v59  ;;  %v1146_v61 = vpop.f32.mrb[10].mxu1  ;;  %v1260_v5 = vmul.f32 0.5, %v1259_v59 }
 0xecd   :  { %v1147_v62 = vadd.f32 %v3984_v49, %v1146_v61  ;;  %v3108_v63 = vpop.f32.mrb[11].mxu1 }
 0xecf   :  { %3630 = vtanh.f32 %v1147_v62  ;;  %v1150_v6 = vmul.f32 0.5, %v1147_v62 }
 0xed0   :  { %3632 = vtanh.f32 %v1260_v5 }
 0xed1   :  { %3634 = vtanh.f32 %v1150_v6 }
 0xed6   :  { %v3629_v0 = vpop.eup %3628 }
 0xed7   :  { %1267 = vrot.lane.b32.xlu1 %v3629_v0, %s3801_s13 }
 0xed9   :  { %v3631_v4 = vpop.eup %3630 }
 0xeda   :  { %v3633_v8 = vpop.eup %3632 }
 0xedb   :  { %1157 = vrot.lane.b32.xlu1 %v3631_v4, %s3801_s13  ;;  %v1262_v12 = vmul.f32 0.5, %v3633_v8  ;;  %v3635_v13 = vpop.eup %3634 }
 0xedc   :  { %v1152_v16 = vmul.f32 0.5, %v3635_v13 }
 0xedd   :  { %v1263_v17 = vadd.f32 0.5, %v1262_v12 }
 0xede   :  { %v1153_v20 = vadd.f32 0.5, %v1152_v16 }
 0xedf   :  { %v1265_v23 = vmul.f32 %v1263_v17, %v4118_v38 }
 0xee0   :  { %v1155_v27 = vmul.f32 %v1153_v20, %v4122_v42 }
 0xf49   :  { %v1268_v18 = vpop.permute.xlu1 %1267 }
 0xf4a   :  { %v1270_v19 = vmul.f32 %v1268_v18, %v1263_v17 }
 0xf4c   :  { %1272 = vrot.lane.b32.xlu0 %v1270_v19, %s3801_s13 }
 0xf4d   :  { %v1158_v21 = vpop.permute.xlu1 %1157 }
 0xf4e   :  { %v1160_v22 = vmul.f32 %v1158_v21, %v1153_v20 }
 0xf50   :  { %1162 = vrot.lane.b32.xlu1 %v1160_v22, %s3801_s13 }
 0xfbe   :  { %v1273_v24 = vpop.permute.xlu0 %1272 }
 0xfbf   :  { %v4160_v26 = vadd.f32 %v1273_v24, %v1265_v23  ;;  %v3810_v23 = vmov 7  }
 0xfc1   :  { %3636 = vtanh.f32 %v4160_v26 }
 0xfc2   :  { %v1163_v28 = vpop.permute.xlu1 %1162 }
 0xfc3   :  { %v4164_v29 = vadd.f32 %v1163_v28, %v1155_v27 }
 0xfc5   :  { %3638 = vtanh.f32 %v4164_v29 }
 0xfcb   :  { %v3637_v30 = vpop.eup %3636 }
 0xfcc   :  { %1278 = vrot.lane.b32.xlu0 %v3637_v30, %s3801_s13 }
 0xfcf   :  { %v3639_v31 = vpop.eup %3638 }
 0xfd0   :  { %1168 = vrot.lane.b32.xlu1 %v3639_v31, %s3801_s13 }
0x103e   :  { %v1279_v35 = vpop.permute.xlu0 %1278 }
0x103f   :  { %v1281_v36 = vmul.f32 %v1279_v35, %v1263_v17 }
0x1041   :  { %1283 = vrot.lane.b32.xlu0 %v1281_v36, %s3803_s14 }
0x1042   :  { %v1169_v38 = vpop.permute.xlu1 %1168 }
0x1043   :  { %v4170_v39 = vmul.f32 %v1169_v38, %v1153_v20 }
0x1045   :  { %1287 = vrot.lane.b32.xlu1 %v4170_v39, %s3805_s16  ;;  %1396 = vperm.xlu0 %3570, %v3908_v9  }
0x1049   :  { %3571 = vset.pattern.permute.xlu0 %v3810_v23 }
0x10b3   :  { %v1284_v40 = vpop.permute.xlu0 %1283 }
0x10b4   :  { %3148 = vmatmul.mubr.msk.f32.vlgmr.msra.gmra.mrb[12].mxu1 %vm90_vm1, %v1284_v40 }
0x10b5   :  { %3435 = vmatpush3.bf16.msra.mxu1 %v3941_v32  ;;  %3166 = vmatprep.mubr.msk.f32.mxu1 %vm3798_vm0, %v3799_v2 }
0x10b6   :  { %3436 = vmatprep.subr.bf16.mxu1 %v3797_v1 }
0x10b7   :  { %v1288_v42 = vpop.permute.xlu1 %1287 }
0x10b8   :  { %v1290_v43 = vsel %vm90_vm1, %v1284_v40, %v1288_v42 }
0x10b9   :  { %3137 = vmatmul.mubr.msk.f32.vlgmr.msra.gmra.mrb[10].mxu0 %vm205_vm2, %v1290_v43  ;;  %3438 = vmatpush3.bf16.msra.mxu1 %v3944_v34 }
0x10ba   :  { %3447 = vmatpush3.bf16.msra.mxu0 %v3903_v7  ;;  %3439 = vmatprep.subr.bf16.mxu1 %v3797_v1 }
0x10bb   :  { %3448 = vmatprep.subr.bf16.mxu0 %v3797_v1  ;;  %3177 = vmatprep.mubr.msk.f32.mxu0 %vm3798_vm0, %v3799_v2 }
0x10bd   :  { %3441 = vmatpush3.bf16.msra.mxu1 %v3948_v37 }
0x10be   :  { %3450 = vmatpush3.bf16.msra.mxu0 %v3912_v10  ;;  %3442 = vmatprep.subr.bf16.mxu1 %v3797_v1 }
0x10bf   :  { %3451 = vmatprep.subr.bf16.mxu0 %v3797_v1 }
0x10c1   :  { %3444 = vmatpush3.bf16.msra.mxu1 %v3953_v41 }
0x10c2   :  { %3463 = vmatprep.subr.bf16.mxu1 %v3797_v1 }
0x10c4   :  { %v1397_v44 = vpop.permute.xlu0 %1396 }
0x10c5   :  { %v1399_v45 = vmul.f32 %v3927_v11, %v1397_v44 }
0x1187   :  { %v1468_v46 = vpop.f32.mrb[12].mxu1 }
0x1188   :  { %v1472_v47 = vadd.f32 %v1468_v46, %v1399_v45  ;;  %v3149_v48 = vpop.f32.mrb[13].mxu1 }
0x118a   :  { %v1473_v51 = vadd.f32 %v3933_v14, %v1472_v47 }
0x118c   :  { %3640 = vtanh.f32 %v1473_v51  ;;  %v1360_v52 = vpop.f32.mrb[10].mxu0  ;;  %v1474_v57 = vmul.f32 0.5, %v1473_v51 }
0x118d   :  { %v1361_v53 = vadd.f32 %v3984_v49, %v1360_v52  ;;  %v3138_v54 = vpop.f32.mrb[11].mxu0 }
0x118f   :  { %3642 = vtanh.f32 %v1361_v53  ;;  %v1364_v58 = vmul.f32 0.5, %v1361_v53 }
0x1190   :  { %3644 = vtanh.f32 %v1474_v57 }
0x1191   :  { %3646 = vtanh.f32 %v1364_v58 }
0x1196   :  { %v3641_v55 = vpop.eup %3640 }
0x1197   :  { %1481 = vrot.lane.b32.xlu1 %v3641_v55, %s3801_s13 }
0x1199   :  { %v3643_v56 = vpop.eup %3642 }
0x119a   :  { %v3645_v59 = vpop.eup %3644 }
0x119b   :  { %1371 = vrot.lane.b32.xlu1 %v3643_v56, %s3801_s13  ;;  %v1476_v61 = vmul.f32 0.5, %v3645_v59  ;;  %v3647_v62 = vpop.eup %3646 }
0x119c   :  { %v1366_v0 = vmul.f32 0.5, %v3647_v62 }
0x119d   :  { %v1477_v63 = vadd.f32 0.5, %v1476_v61 }
0x119e   :  { %v1367_v6 = vadd.f32 0.5, %v1366_v0 }
0x119f   :  { %v1479_v13 = vmul.f32 %v1477_v63, %v4160_v26 }
0x11a0   :  { %v1369_v18 = vmul.f32 %v1367_v6, %v4164_v29 }
0x1209   :  { %v1482_v4 = vpop.permute.xlu1 %1481 }
0x120a   :  { %v1484_v5 = vmul.f32 %v1482_v4, %v1477_v63 }
0x120c   :  { %1486 = vrot.lane.b32.xlu0 %v1484_v5, %s3801_s13 }
0x120d   :  { %v1372_v8 = vpop.permute.xlu1 %1371 }
0x120e   :  { %v1374_v12 = vmul.f32 %v1372_v8, %v1367_v6 }
0x1210   :  { %1376 = vrot.lane.b32.xlu1 %v1374_v12, %s3801_s13 }
0x127e   :  { %v1487_v16 = vpop.permute.xlu0 %1486 }
0x127f   :  { %v4202_v17 = vadd.f32 %v1487_v16, %v1479_v13 }
0x1281   :  { %3648 = vtanh.f32 %v4202_v17 }
0x1282   :  { %v1377_v19 = vpop.permute.xlu1 %1376 }
0x1283   :  { %v4206_v20 = vadd.f32 %v1377_v19, %v1369_v18 }
0x1285   :  { %3650 = vtanh.f32 %v4206_v20 }
0x128b   :  { %v3649_v21 = vpop.eup %3648 }
0x128c   :  { %1492 = vrot.lane.b32.xlu0 %v3649_v21, %s3801_s13 }
0x128f   :  { %v3651_v22 = vpop.eup %3650 }
0x1290   :  { %1382 = vrot.lane.b32.xlu1 %v3651_v22, %s3801_s13 }
0x12fe   :  { %v1493_v24 = vpop.permute.xlu0 %1492 }
0x12ff   :  { %v1495_v26 = vmul.f32 %v1493_v24, %v1477_v63 }
0x1301   :  { %1497 = vrot.lane.b32.xlu0 %v1495_v26, %s3803_s14 }
0x1302   :  { %v1383_v27 = vpop.permute.xlu1 %1382 }
0x1303   :  { %v4212_v28 = vmul.f32 %v1383_v27, %v1367_v6 }
0x1305   :  { %1501 = vrot.lane.b32.xlu1 %v4212_v28, %s3805_s16  ;;  %1610 = vperm.xlu0 %3571, %v3908_v9  }
0x1309   :  { %3572 = vset.pattern.permute.xlu0 %v3800_v3 }
0x1373   :  { %v1498_v29 = vpop.permute.xlu0 %1497 }
0x1374   :  { %3178 = vmatmul.mubr.msk.f32.vlgmr.msra.gmra.mrb[12].mxu0 %vm90_vm1, %v1498_v29 }
0x1375   :  { %3453 = vmatpush3.bf16.msra.mxu0 %v3941_v32  ;;  %3196 = vmatprep.mubr.msk.f32.mxu0 %vm3798_vm0, %v3799_v2 }
0x1376   :  { %3454 = vmatprep.subr.bf16.mxu0 %v3797_v1 }
0x1377   :  { %v1502_v30 = vpop.permute.xlu1 %1501 }
0x1378   :  { %v1504_v31 = vsel %vm90_vm1, %v1498_v29, %v1502_v30 }
0x1379   :  { %3167 = vmatmul.mubr.msk.f32.vlgmr.msra.gmra.mrb[14].mxu1 %vm205_vm2, %v1504_v31  ;;  %3456 = vmatpush3.bf16.msra.mxu0 %v3944_v34 }
0x137a   :  { %3457 = vmatprep.subr.bf16.mxu0 %v3797_v1  ;;  %3465 = vmatpush3.bf16.msra.mxu1 %v3903_v7 }
0x137b   :  { %3466 = vmatprep.subr.bf16.mxu1 %v3797_v1  ;;  %3207 = vmatprep.mubr.msk.f32.mxu1 %vm3798_vm0, %v3799_v2 }
0x137d   :  { %3459 = vmatpush3.bf16.msra.mxu0 %v3948_v37 }
0x137e   :  { %3460 = vmatprep.subr.bf16.mxu0 %v3797_v1  ;;  %3468 = vmatpush3.bf16.msra.mxu1 %v3912_v10 }
0x137f   :  { %3469 = vmatprep.subr.bf16.mxu1 %v3797_v1 }
0x1381   :  { %3462 = vmatpush3.bf16.msra.mxu0 %v3953_v41 }
0x1382   :  { %3481 = vmatprep.subr.bf16.mxu0 %v3797_v1 }
0x1384   :  { %v1611_v3 = vpop.permute.xlu0 %1610 }
0x1385   :  { %v1613_v9 = vmul.f32 %v3927_v11, %v1611_v3 }
0x1447   :  { %v1682_v33 = vpop.f32.mrb[12].mxu0 }
0x1448   :  { %v3179_v35 = vpop.f32.mrb[13].mxu0  ;;  %v1686_v36 = vadd.f32 %v1682_v33, %v1613_v9  ;;  %v2767_v9 = vld [vmem:[%s4519_s6] ss:$0 sm:$0xff] }
0x144a   :  { %v1687_v43 = vadd.f32 %v3933_v14, %v1686_v36 }
0x144c   :  { %v1574_v38 = vpop.f32.mrb[14].mxu1  ;;  %v1688_v47 = vmul.f32 0.5, %v1687_v43 }
0x144d   :  { %v1575_v40 = vadd.f32 %v3984_v49, %v1574_v38  ;;  %v3168_v42 = vpop.f32.mrb[15].mxu1 }
0x144f   :  { %3652 = vtanh.f32 %v1575_v40  ;;  %v1578_v46 = vmul.f32 0.5, %v1575_v40 }
0x1450   :  { %3654 = vtanh.f32 %v1687_v43 }
0x1451   :  { %3656 = vtanh.f32 %v1578_v46  ;;  %v4291_v46 = vld [vmem:[#allocation2] ss:$0 sm:$0xff] }
0x1452   :  { %3658 = vtanh.f32 %v1688_v47 }
0x1459   :  { %v3653_v44 = vpop.eup %3652 }
0x145a   :  { %1585 = vrot.lane.b32.xlu1 %v3653_v44, %s3801_s13  ;;  %v3655_v45 = vpop.eup %3654 }
0x145b   :  { %v3657_v11 = vpop.eup %3656 }
0x145c   :  { %v1580_v48 = vmul.f32 0.5, %v3657_v11  ;;  %v3659_v51 = vpop.eup %3658 }
0x145d   :  { %v1690_v53 = vmul.f32 0.5, %v3659_v51  ;;  %v4300_v51 = vld [vmem:[%s4514_s1] ss:$0 sm:$0xff] }
0x145e   :  { %1695 = vrot.lane.b32.xlu1 %v3655_v45, %s3801_s13  ;;  %v1581_v52 = vadd.f32 0.5, %v1580_v48 }
0x145f   :  { %v1691_v14 = vadd.f32 0.5, %v1690_v53 }
0x1460   :  { %v1583_v58 = vmul.f32 %v1581_v52, %v4206_v20 }
0x1461   :  { %v1693_v62 = vmul.f32 %v1691_v14, %v4202_v17 }
0x14cc   :  { %v1586_v54 = vpop.permute.xlu1 %1585 }
0x14cd   :  { %v1588_v55 = vmul.f32 %v1586_v54, %v1581_v52  ;;  %v4306_v54 = vld [vmem:[%s4516_s3] ss:$0 sm:$0xff] }
0x14cf   :  { %1590 = vrot.lane.b32.xlu0 %v1588_v55, %s3801_s13 }
0x14d0   :  { %v1696_v56 = vpop.permute.xlu1 %1695 }
0x14d1   :  { %v1698_v57 = vmul.f32 %v1696_v56, %v1691_v14 }
0x14d3   :  { %1700 = vrot.lane.b32.xlu1 %v1698_v57, %s3801_s13 }
0x1541   :  { %v1591_v59 = vpop.permute.xlu0 %1590 }
0x1542   :  { %v1593_v61 = vadd.f32 %v1591_v59, %v1583_v58 }
0x1544   :  { %3660 = vtanh.f32 %v1593_v61 }
0x1545   :  { %v1701_v63 = vpop.permute.xlu1 %1700 }
0x1546   :  { %v4246_v0 = vadd.f32 %v1701_v63, %v1693_v62 }
0x1548   :  { %3662 = vtanh.f32 %v4246_v0 }
0x154e   :  { %v3661_v4 = vpop.eup %3660 }
0x154f   :  { %1596 = vrot.lane.b32.xlu0 %v3661_v4, %s3801_s13 }
0x1552   :  { %v3663_v5 = vpop.eup %3662 }
0x1553   :  { %1706 = vrot.lane.b32.xlu1 %v3663_v5, %s3801_s13 }
0x15c1   :  { %v1597_v6 = vpop.permute.xlu0 %1596 }
0x15c2   :  { %v4251_v8 = vmul.f32 %v1597_v6, %v1581_v52 }
0x15c4   :  { %1715 = vrot.lane.b32.xlu1 %v4251_v8, %s3805_s16 }
0x15c5   :  { %v1707_v12 = vpop.permute.xlu1 %1706 }
0x15c6   :  { %v1709_v13 = vmul.f32 %v1707_v12, %v1691_v14 }
0x15c8   :  { %1711 = vrot.lane.b32.xlu0 %v1709_v13, %s3803_s14 }
0x1636   :  { %v1716_v16 = vpop.permute.xlu1 %1715 }
0x163a   :  { %v1712_v17 = vpop.permute.xlu0 %1711 }
0x163b   :  { %v1718_v18 = vsel %vm90_vm1, %v1712_v17, %v1716_v16  ;;  %3208 = vmatmul.mubr.msk.f32.vlgmr.msra.gmra.mrb[16].mxu1 %vm90_vm1, %v1712_v17 }
0x163c   :  { %3197 = vmatmul.mubr.msk.f32.vlgmr.msra.gmra.mrb[14].mxu0 %vm205_vm2, %v1718_v18  ;;  %3471 = vmatpush3.bf16.msra.mxu1 %v3941_v32 }
0x163d   :  { %3472 = vmatprep.subr.bf16.mxu1 %v3797_v1  ;;  %3483 = vmatpush3.bf16.msra.mxu0 %v3903_v7 }
0x163e   :  { %3484 = vmatprep.subr.bf16.mxu0 %v3797_v1  ;;  %3237 = vmatprep.mubr.msk.f32.mxu0 %vm3798_vm0, %v3799_v2 }
0x163f   :  { %3226 = vmatprep.mubr.msk.f32.mxu1 %vm3798_vm0, %v3799_v2 }
0x1640   :  { %3474 = vmatpush3.bf16.msra.mxu1 %v3944_v34 }
0x1641   :  { %3475 = vmatprep.subr.bf16.mxu1 %v3797_v1  ;;  %3486 = vmatpush3.bf16.msra.mxu0 %v3912_v10 }
0x1642   :  { %3487 = vmatprep.subr.bf16.mxu0 %v3797_v1 }
0x1644   :  { %3477 = vmatpush3.bf16.msra.mxu1 %v3948_v37 }
0x1645   :  { %3478 = vmatprep.subr.bf16.mxu1 %v3797_v1 }
0x1648   :  { %3480 = vmatpush3.bf16.msra.mxu1 %v3953_v41 }
0x1649   :  { %3499 = vmatprep.subr.bf16.mxu1 %v3797_v1 }
0x170e   :  { %v1897_v19 = vpop.f32.mrb[16].mxu1 }
0x170f   :  { %v1788_v20 = vpop.f32.mrb[14].mxu0  ;;  %v3209_v21 = vpop.f32.mrb[17].mxu1 }
0x1710   :  { %v1789_v22 = vadd.f32 %v3984_v49, %v1788_v20  ;;  %v3198_v23 = vpop.f32.mrb[15].mxu0  ;;  %v4340_v21 = vld [vmem:[%s4518_s5] ss:$0 sm:$0xff]  ;;  %s3811_s5 = smov 1  }
0x1712   :  { %3664 = vtanh.f32 %v1789_v22  ;;  %v1792_v26 = vmul.f32 0.5, %v1789_v22 }
0x1714   :  { %3666 = vtanh.f32 %v1792_v26 }
0x171c   :  { %v3665_v24 = vpop.eup %3664 }
0x171d   :  { %1799 = vrot.lane.b32.xlu0 %v3665_v24, %s3801_s13 }
0x171e   :  { %v3667_v27 = vpop.eup %3666 }
0x171f   :  { %v1794_v29 = vmul.f32 0.5, %v3667_v27 }
0x1721   :  { %v1795_v30 = vadd.f32 0.5, %v1794_v29 }
0x1723   :  { %v1797_v49 = vmul.f32 %v1795_v30, %v1593_v61 }
0x178f   :  { %v1800_v31 = vpop.permute.xlu0 %1799 }
0x1790   :  { %v1802_v3 = vmul.f32 %v1800_v31, %v1795_v30 }
0x1792   :  { %1804 = vrot.lane.b32.xlu1 %v1802_v3, %s3801_s13 }
0x1796   :  { %306 = vrot.lane.b32.xlu1 %v2767_v9, %s3803_s14 }
0x1804   :  { %v1805_v33 = vpop.permute.xlu1 %1804 }
0x1805   :  { %v4282_v35 = vadd.f32 %v1805_v33, %v1797_v49 }
0x1807   :  { %3668 = vtanh.f32 %v4282_v35 }
0x1808   :  { %v4286_v42 = vpop.permute.xlu1 %306 }
0x1811   :  { %v3669_v36 = vpop.eup %3668 }
0x1812   :  { %1810 = vrot.lane.b32.xlu0 %v3669_v36, %s3801_s13 }
0x1884   :  { %v1811_v38 = vpop.permute.xlu0 %1810 }
0x1885   :  { %v1813_v40 = vmul.f32 %v1811_v38, %v1795_v30 }
0x1887   :  { %v1814_v43 = vmul.f32 %v1813_v40, %v4286_v42 }
0x1889   :  { %1816 = vrot.lane.b32.xlu0 %v1814_v43, %s3803_s14 }
0x18fb   :  { %v1817_v44 = vpop.permute.xlu0 %1816 }
0x18fc   :  { %v1819_v45 = vsel %vm314_vm3, %v1817_v44, 0.0 }
0x18fd   :  { %1820 = vadd.xlane.f32.xlu1 %v1819_v45 }
0x198a   :  { %v1821_v47 = vpop.xlane.xlu1 %1820 }
0x198b   :  { %v4294_v11 = vadd.f32 %v4291_v46, %v1821_v47 }
0x198d   :  { %1825 = vperm.xlu0 %3572, %v4294_v11  }
0x1a0c   :  { %v1826_v48 = vpop.permute.xlu0 %1825 }
0x1a0d   :  { %v1828_v52 = vmul.f32 %v4300_v51, %v1826_v48 }
0x1a0f   :  { %v1901_v53 = vadd.f32 %v1897_v19, %v1828_v52 }
0x1a11   :  { %v1902_v55 = vadd.f32 %v4306_v54, %v1901_v53 }
0x1a13   :  { %3670 = vtanh.f32 %v1902_v55  ;;  %v1903_v56 = vmul.f32 0.5, %v1902_v55 }
0x1a15   :  { %3672 = vtanh.f32 %v1903_v56 }
0x1a1d   :  { %v3671_v14 = vpop.eup %3670 }
0x1a1e   :  { %1910 = vrot.lane.b32.xlu0 %v3671_v14, %s3801_s13 }
0x1a1f   :  { %v3673_v57 = vpop.eup %3672 }
0x1a20   :  { %v1905_v58 = vmul.f32 0.5, %v3673_v57 }
0x1a22   :  { %v1906_v59 = vadd.f32 0.5, %v1905_v58 }
0x1a24   :  { %v1908_v63 = vmul.f32 %v1906_v59, %v4246_v0 }
0x1a90   :  { %v1911_v61 = vpop.permute.xlu0 %1910 }
0x1a91   :  { %v1913_v62 = vmul.f32 %v1911_v61, %v1906_v59 }
0x1a93   :  { %1915 = vrot.lane.b32.xlu0 %v1913_v62, %s3801_s13 }
0x1b05   :  { %v1916_v4 = vpop.permute.xlu0 %1915 }
0x1b06   :  { %v4312_v5 = vadd.f32 %v1916_v4, %v1908_v63 }
0x1b08   :  { %3674 = vtanh.f32 %v4312_v5 }
0x1b12   :  { %v3675_v6 = vpop.eup %3674 }
0x1b13   :  { %1921 = vrot.lane.b32.xlu0 %v3675_v6, %s3801_s13 }
0x1b85   :  { %v1922_v12 = vpop.permute.xlu0 %1921 }
0x1b86   :  { %v1924_v13 = vmul.f32 %v1922_v12, %v1906_v59 }
0x1b88   :  { %1926 = vrot.lane.b32.xlu0 %v1924_v13, %s3803_s14 }
0x1b8c   :  { %1930 = vrot.lane.b32.xlu0 %v1813_v40, %s3805_s16 }
0x1bfa   :  { %v1927_v16 = vpop.permute.xlu0 %1926 }
0x1bfb   :  { %3238 = vmatmul.mubr.msk.f32.vlgmr.msra.gmra.mrb[16].mxu0 %vm90_vm1, %v1927_v16 }
0x1bfc   :  { %3489 = vmatpush3.bf16.msra.mxu0 %v3941_v32  ;;  %3256 = vmatprep.mubr.msk.f32.mxu0 %vm3798_vm0, %v3799_v2 }
0x1bfd   :  { %3490 = vmatprep.subr.bf16.mxu0 %v3797_v1 }
0x1bfe   :  { %v1931_v0 = vpop.permute.xlu0 %1930 }
0x1bff   :  { %v1933_v17 = vsel %vm90_vm1, %v1927_v16, %v1931_v0 }
0x1c00   :  { %3227 = vmatmul.mubr.msk.f32.vlgmr.msra.gmra.mrb[18].mxu1 %vm205_vm2, %v1933_v17  ;;  %3492 = vmatpush3.bf16.msra.mxu0 %v3944_v34 }
0x1c01   :  { %3501 = vmatpush3.bf16.msra.mxu1 %v3903_v7  ;;  %3493 = vmatprep.subr.bf16.mxu0 %v3797_v1 }
0x1c02   :  { %3502 = vmatprep.subr.bf16.mxu1 %v3797_v1  ;;  %3267 = vmatprep.mubr.msk.f32.mxu1 %vm3798_vm0, %v3799_v2 }
0x1c04   :  { %3495 = vmatpush3.bf16.msra.mxu0 %v3948_v37 }
0x1c05   :  { %3504 = vmatpush3.bf16.msra.mxu1 %v3912_v10  ;;  %3496 = vmatprep.subr.bf16.mxu0 %v3797_v1 }
0x1c06   :  { %3505 = vmatprep.subr.bf16.mxu1 %v3797_v1 }
0x1c08   :  { %3498 = vmatpush3.bf16.msra.mxu0 %v3953_v41 }
0x1c09   :  { %3517 = vmatprep.subr.bf16.mxu0 %v3797_v1 }
0x1cce   :  { %v2112_v18 = vpop.f32.mrb[16].mxu0 }
0x1ccf   :  { %v3239_v19 = vpop.f32.mrb[17].mxu0 }
0x1cd3   :  { %v2003_v20 = vpop.f32.mrb[18].mxu1 }
0x1cd4   :  { %v2004_v22 = vadd.f32 %v4340_v21, %v2003_v20  ;;  %v3228_v23 = vpop.f32.mrb[19].mxu1 }
0x1cd6   :  { %3676 = vtanh.f32 %v2004_v22  ;;  %v2007_v26 = vmul.f32 0.5, %v2004_v22 }
0x1cd8   :  { %3678 = vtanh.f32 %v2007_v26 }
0x1ce0   :  { %v3677_v24 = vpop.eup %3676 }
0x1ce1   :  { %2014 = vrot.lane.b32.xlu0 %v3677_v24, %s3801_s13 }
0x1ce2   :  { %v3679_v27 = vpop.eup %3678 }
0x1ce3   :  { %v2009_v29 = vmul.f32 0.5, %v3679_v27 }
0x1ce5   :  { %v2010_v30 = vadd.f32 0.5, %v2009_v29 }
0x1ce7   :  { %v2012_v9 = vmul.f32 %v2010_v30, %v4282_v35 }
0x1d53   :  { %v2015_v31 = vpop.permute.xlu0 %2014 }
0x1d54   :  { %v2017_v3 = vmul.f32 %v2015_v31, %v2010_v30 }
0x1d56   :  { %2019 = vrot.lane.b32.xlu0 %v2017_v3, %s3801_s13 }
0x1dc8   :  { %v2020_v49 = vpop.permute.xlu0 %2019 }
0x1dc9   :  { %v4346_v33 = vadd.f32 %v2020_v49, %v2012_v9 }
0x1dcb   :  { %3680 = vtanh.f32 %v4346_v33 }
0x1dd5   :  { %v3681_v36 = vpop.eup %3680 }
0x1dd6   :  { %2025 = vrot.lane.b32.xlu1 %v3681_v36, %s3801_s13 }
0x1e48   :  { %v2026_v38 = vpop.permute.xlu1 %2025 }
0x1e49   :  { %v2028_v40 = vmul.f32 %v2026_v38, %v2010_v30 }
0x1e4b   :  { %v2029_v43 = vmul.f32 %v2028_v40, %v4286_v42 }
0x1e4d   :  { %2031 = vrot.lane.b32.xlu0 %v2029_v43, %s3803_s14 }
0x1ebf   :  { %v2032_v44 = vpop.permute.xlu0 %2031 }
0x1ec0   :  { %v2034_v45 = vsel %vm314_vm3, %v2032_v44, 0.0 }
0x1ec1   :  { %2035 = vadd.xlane.f32.xlu0 %v2034_v45 }
0x1f4e   :  { %v2036_v47 = vpop.xlane.xlu0 %2035 }
0x1f4f   :  { %v4354_v35 = vadd.f32 %v4291_v46, %v2036_v47 }
0x1f51   :  { %2040 = vperm.xlu1 %3573, %v4354_v35  }
0x1fd0   :  { %v2041_v48 = vpop.permute.xlu1 %2040 }
0x1fd1   :  { %v2043_v52 = vmul.f32 %v4300_v51, %v2041_v48 }
0x1fd3   :  { %v2116_v53 = vadd.f32 %v2112_v18, %v2043_v52 }
0x1fd5   :  { %v2117_v55 = vadd.f32 %v4306_v54, %v2116_v53 }
0x1fd7   :  { %3682 = vtanh.f32 %v2117_v55  ;;  %v2118_v56 = vmul.f32 0.5, %v2117_v55 }
0x1fd9   :  { %3684 = vtanh.f32 %v2118_v56 }
0x1fe1   :  { %v3683_v14 = vpop.eup %3682 }
0x1fe2   :  { %2125 = vrot.lane.b32.xlu1 %v3683_v14, %s3801_s13 }
0x1fe3   :  { %v3685_v57 = vpop.eup %3684 }
0x1fe4   :  { %v2120_v58 = vmul.f32 0.5, %v3685_v57 }
0x1fe6   :  { %v2121_v59 = vadd.f32 0.5, %v2120_v58 }
0x1fe8   :  { %v2123_v63 = vmul.f32 %v2121_v59, %v4312_v5 }
0x2054   :  { %v2126_v61 = vpop.permute.xlu1 %2125 }
0x2055   :  { %v2128_v62 = vmul.f32 %v2126_v61, %v2121_v59 }
0x2057   :  { %2130 = vrot.lane.b32.xlu1 %v2128_v62, %s3801_s13 }
0x20c9   :  { %v2131_v4 = vpop.permute.xlu1 %2130 }
0x20ca   :  { %v4362_v6 = vadd.f32 %v2131_v4, %v2123_v63 }
0x20cc   :  { %3686 = vtanh.f32 %v4362_v6 }
0x20d6   :  { %v3687_v12 = vpop.eup %3686 }
0x20d7   :  { %2136 = vrot.lane.b32.xlu1 %v3687_v12, %s3801_s13 }
0x2149   :  { %v2137_v13 = vpop.permute.xlu1 %2136 }
0x214a   :  { %v2139_v16 = vmul.f32 %v2137_v13, %v2121_v59 }
0x214c   :  { %2141 = vrot.lane.b32.xlu1 %v2139_v16, %s3803_s14 }
0x2150   :  { %2145 = vrot.lane.b32.xlu1 %v2028_v40, %s3805_s16 }
0x21be   :  { %v2142_v0 = vpop.permute.xlu1 %2141 }
0x21bf   :  { %3268 = vmatmul.mubr.msk.f32.vlgmr.msra.gmra.mrb[20].mxu1 %vm90_vm1, %v2142_v0 }
0x21c0   :  { %3507 = vmatpush3.bf16.msra.mxu1 %v3941_v32  ;;  %3286 = vmatprep.mubr.msk.f32.mxu1 %vm3798_vm0, %v3799_v2 }
0x21c1   :  { %3508 = vmatprep.subr.bf16.mxu1 %v3797_v1 }
0x21c2   :  { %v2146_v5 = vpop.permute.xlu1 %2145 }
0x21c3   :  { %v2148_v17 = vsel %vm90_vm1, %v2142_v0, %v2146_v5 }
0x21c4   :  { %3257 = vmatmul.mubr.msk.f32.vlgmr.msra.gmra.mrb[18].mxu0 %vm205_vm2, %v2148_v17  ;;  %3510 = vmatpush3.bf16.msra.mxu1 %v3944_v34 }
0x21c5   :  { %3519 = vmatpush3.bf16.msra.mxu0 %v3903_v7  ;;  %3511 = vmatprep.subr.bf16.mxu1 %v3797_v1 }
0x21c6   :  { %3520 = vmatprep.subr.bf16.mxu0 %v3797_v1  ;;  %3297 = vmatprep.mubr.msk.f32.mxu0 %vm3798_vm0, %v3799_v2 }
0x21c8   :  { %3513 = vmatpush3.bf16.msra.mxu1 %v3948_v37 }
0x21c9   :  { %3522 = vmatpush3.bf16.msra.mxu0 %v3912_v10  ;;  %3514 = vmatprep.subr.bf16.mxu1 %v3797_v1 }
0x21ca   :  { %3523 = vmatprep.subr.bf16.mxu0 %v3797_v1 }
0x21cc   :  { %3516 = vmatpush3.bf16.msra.mxu1 %v3953_v41 }
0x2292   :  { %v2327_v18 = vpop.f32.mrb[20].mxu1 }
0x2293   :  { %v3269_v19 = vpop.f32.mrb[21].mxu1 }
0x2297   :  { %v2218_v7 = vpop.f32.mrb[18].mxu0 }
0x2298   :  { %v2219_v20 = vadd.f32 %v4340_v21, %v2218_v7  ;;  %v3258_v22 = vpop.f32.mrb[19].mxu0 }
0x229a   :  { %3688 = vtanh.f32 %v2219_v20  ;;  %v2222_v24 = vmul.f32 0.5, %v2219_v20 }
0x229c   :  { %3690 = vtanh.f32 %v2222_v24 }
0x22a4   :  { %v3689_v23 = vpop.eup %3688 }
0x22a5   :  { %2229 = vrot.lane.b32.xlu0 %v3689_v23, %s3801_s13 }
0x22a6   :  { %v3691_v26 = vpop.eup %3690 }
0x22a7   :  { %v2224_v10 = vmul.f32 0.5, %v3691_v26 }
0x22a9   :  { %v2225_v27 = vadd.f32 0.5, %v2224_v10 }
0x22ab   :  { %v2227_v31 = vmul.f32 %v2225_v27, %v4346_v33 }
0x2317   :  { %v2230_v29 = vpop.permute.xlu0 %2229 }
0x2318   :  { %v2232_v30 = vmul.f32 %v2230_v29, %v2225_v27 }
0x231a   :  { %2234 = vrot.lane.b32.xlu1 %v2232_v30, %s3801_s13 }
0x238c   :  { %v2235_v3 = vpop.permute.xlu1 %2234 }
0x238d   :  { %v4390_v9 = vadd.f32 %v2235_v3, %v2227_v31 }
0x238f   :  { %3692 = vtanh.f32 %v4390_v9 }
0x2399   :  { %v3693_v49 = vpop.eup %3692 }
0x239a   :  { %2240 = vrot.lane.b32.xlu1 %v3693_v49, %s3801_s13 }
0x240c   :  { %v2241_v36 = vpop.permute.xlu1 %2240 }
0x240d   :  { %v2243_v38 = vmul.f32 %v2241_v36, %v2225_v27 }
0x240f   :  { %v2244_v40 = vmul.f32 %v2243_v38, %v4286_v42 }
0x2411   :  { %2246 = vrot.lane.b32.xlu1 %v2244_v40, %s3803_s14 }
0x2483   :  { %v2247_v43 = vpop.permute.xlu1 %2246 }
0x2484   :  { %v2249_v44 = vsel %vm314_vm3, %v2247_v43, 0.0 }
0x2485   :  { %2250 = vadd.xlane.f32.xlu1 %v2249_v44 }
0x2512   :  { %v2251_v45 = vpop.xlane.xlu1 %2250 }
0x2513   :  { %v4398_v33 = vadd.f32 %v4291_v46, %v2251_v45 }
0x2515   :  { %2255 = vperm.xlu0 %3572, %v4398_v33  }
0x2594   :  { %v2256_v47 = vpop.permute.xlu0 %2255 }
0x2595   :  { %v2258_v48 = vmul.f32 %v4300_v51, %v2256_v47 }
0x2597   :  { %v2331_v52 = vadd.f32 %v2327_v18, %v2258_v48 }
0x2599   :  { %v2332_v53 = vadd.f32 %v4306_v54, %v2331_v52 }
0x259b   :  { %3694 = vtanh.f32 %v2332_v53  ;;  %v2333_v14 = vmul.f32 0.5, %v2332_v53 }
0x259d   :  { %3696 = vtanh.f32 %v2333_v14 }
0x25a5   :  { %v3695_v55 = vpop.eup %3694 }
0x25a6   :  { %2340 = vrot.lane.b32.xlu0 %v3695_v55, %s3801_s13 }
0x25a7   :  { %v3697_v56 = vpop.eup %3696 }
0x25a8   :  { %v2335_v57 = vmul.f32 0.5, %v3697_v56 }
0x25aa   :  { %v2336_v58 = vadd.f32 0.5, %v2335_v57 }
0x25ac   :  { %v2338_v62 = vmul.f32 %v2336_v58, %v4362_v6 }
0x2618   :  { %v2341_v59 = vpop.permute.xlu0 %2340 }
0x2619   :  { %v2343_v61 = vmul.f32 %v2341_v59, %v2336_v58 }
0x261b   :  { %2345 = vrot.lane.b32.xlu0 %v2343_v61, %s3801_s13 }
0x268d   :  { %v2346_v63 = vpop.permute.xlu0 %2345 }
0x268e   :  { %v4406_v4 = vadd.f32 %v2346_v63, %v2338_v62 }
0x2690   :  { %3698 = vtanh.f32 %v4406_v4 }
0x269a   :  { %v3699_v12 = vpop.eup %3698 }
0x269b   :  { %2351 = vrot.lane.b32.xlu0 %v3699_v12, %s3801_s13 }
0x270d   :  { %v2352_v13 = vpop.permute.xlu0 %2351 }
0x270e   :  { %v2354_v16 = vmul.f32 %v2352_v13, %v2336_v58 }
0x2710   :  { %2356 = vrot.lane.b32.xlu0 %v2354_v16, %s3803_s14  ;;  %v530_v16 = vmul.f32 %v4044_v15, %v4286_v42 }
0x2714   :  { %2360 = vrot.lane.b32.xlu0 %v2243_v38, %s3805_s16 }
0x2782   :  { %v2357_v0 = vpop.permute.xlu0 %2356 }
0x2783   :  { %3298 = vmatmul.mubr.msk.f32.vlgmr.msra.gmra.mrb[20].mxu0 %vm90_vm1, %v2357_v0 }
0x2784   :  { %3525 = vmatpush3.bf16.msra.mxu0 %v3941_v32  ;;  %3316 = vmatprep.mubr.msk.f32.mxu0 %vm3798_vm0, %v3799_v2 }
0x2785   :  { %3526 = vmatprep.subr.bf16.mxu0 %v3797_v1 }
0x2786   :  { %v2361_v6 = vpop.permute.xlu0 %2360 }
0x2787   :  { %v2363_v5 = vsel %vm90_vm1, %v2357_v0, %v2361_v6 }
0x2788   :  { %3287 = vmatmul.mubr.msk.f32.vlgmr.msra.gmra.mrb[22].mxu1 %vm205_vm2, %v2363_v5  ;;  %3528 = vmatpush3.bf16.msra.mxu0 %v3944_v34 }
0x2789   :  { %3529 = vmatprep.subr.bf16.mxu0 %v3797_v1 }
0x278c   :  { %3531 = vmatpush3.bf16.msra.mxu0 %v3948_v37 }
0x278d   :  { %3532 = vmatprep.subr.bf16.mxu0 %v3797_v1 }
0x2790   :  { %3534 = vmatpush3.bf16.msra.mxu0 %v3953_v41 }
0x2856   :  { %v2542_v32 = vpop.f32.mrb[20].mxu0 }
0x2857   :  { %v3299_v17 = vpop.f32.mrb[21].mxu0 }
0x285b   :  { %v2433_v2 = vpop.f32.mrb[22].mxu1 }
0x285c   :  { %v2434_v18 = vadd.f32 %v4340_v21, %v2433_v2  ;;  %v3288_v19 = vpop.f32.mrb[23].mxu1 }
0x285d   :  { %v309_v19 = vmul.f32 %v4286_v42, %v4001_v25  ;;  %v744_v25 = vmul.f32 %v4086_v60, %v4286_v42  ;;  %v1172_v60 = vmul.f32 %v4170_v39, %v4286_v42 }
0x285e   :  { %3700 = vtanh.f32 %v2434_v18  ;;  %v2437_v20 = vmul.f32 0.5, %v2434_v18 }
0x2860   :  { %3702 = vtanh.f32 %v2437_v20 }
0x2868   :  { %v3701_v7 = vpop.eup %3700 }
0x2869   :  { %2444 = vrot.lane.b32.xlu0 %v3701_v7, %s3801_s13 }
0x286a   :  { %v3703_v34 = vpop.eup %3702 }
0x286b   :  { %v2439_v22 = vmul.f32 0.5, %v3703_v34 }
0x286d   :  { %v2440_v23 = vadd.f32 0.5, %v2439_v22 }
0x286f   :  { %v2442_v1 = vmul.f32 %v2440_v23, %v4390_v9 }
0x28db   :  { %v2445_v37 = vpop.permute.xlu0 %2444 }
0x28dc   :  { %v2447_v24 = vmul.f32 %v2445_v37, %v2440_v23  ;;  %v958_v37 = vmul.f32 %v4128_v50, %v4286_v42  ;;  %v1386_v50 = vmul.f32 %v4212_v28, %v4286_v42 }
0x28de   :  { %2449 = vrot.lane.b32.xlu0 %v2447_v24, %s3801_s13 }
0x2950   :  { %v2450_v41 = vpop.permute.xlu0 %2449 }
0x2951   :  { %v4428_v26 = vadd.f32 %v2450_v41, %v2442_v1 }
0x2953   :  { %3704 = vtanh.f32 %v4428_v26 }
0x295d   :  { %v3705_v10 = vpop.eup %3704 }
0x295e   :  { %2455 = vrot.lane.b32.xlu1 %v3705_v10, %s3801_s13 }
0x29d0   :  { %v2456_v27 = vpop.permute.xlu1 %2455 }
0x29d1   :  { %v2458_v29 = vmul.f32 %v2456_v27, %v2440_v23 }
0x29d3   :  { %v2459_v30 = vmul.f32 %v2458_v29, %v4286_v42 }
0x29d5   :  { %2461 = vrot.lane.b32.xlu0 %v2459_v30, %s3803_s14 }
0x2a47   :  { %v2462_v31 = vpop.permute.xlu0 %2461 }
0x2a48   :  { %v2464_v3 = vsel %vm314_vm3, %v2462_v31, 0.0  ;;  %v1600_v31 = vmul.f32 %v4251_v8, %v4286_v42 }
0x2a49   :  { %2465 = vadd.xlane.f32.xlu0 %v2464_v3 }
0x2ad6   :  { %v2466_v49 = vpop.xlane.xlu0 %2465 }
0x2ad7   :  { %v4436_v9 = vadd.f32 %v4291_v46, %v2466_v49 }
0x2ad9   :  { %2470 = vperm.xlu1 %3573, %v4436_v9  }
0x2b58   :  { %v2471_v36 = vpop.permute.xlu1 %2470 }
0x2b59   :  { %v2473_v38 = vmul.f32 %v4300_v51, %v2471_v36 }
0x2b5b   :  { %v2546_v40 = vadd.f32 %v2542_v32, %v2473_v38 }
0x2b5d   :  { %v2547_v43 = vadd.f32 %v4306_v54, %v2546_v40 }
0x2b5f   :  { %3706 = vtanh.f32 %v2547_v43  ;;  %v2548_v45 = vmul.f32 0.5, %v2547_v43 }
0x2b61   :  { %3708 = vtanh.f32 %v2548_v45 }
0x2b69   :  { %v3707_v44 = vpop.eup %3706 }
0x2b6a   :  { %2555 = vrot.lane.b32.xlu1 %v3707_v44, %s3801_s13 }
0x2b6b   :  { %v3709_v47 = vpop.eup %3708 }
0x2b6c   :  { %v2550_v48 = vmul.f32 0.5, %v3709_v47 }
0x2b6e   :  { %v2551_v52 = vadd.f32 0.5, %v2550_v48 }
0x2b70   :  { %v2553_v14 = vmul.f32 %v2551_v52, %v4406_v4 }
0x2bdc   :  { %v2556_v53 = vpop.permute.xlu1 %2555 }
0x2bdd   :  { %v2558_v55 = vmul.f32 %v2556_v53, %v2551_v52 }
0x2bdf   :  { %2560 = vrot.lane.b32.xlu1 %v2558_v55, %s3801_s13 }
0x2c51   :  { %v2561_v56 = vpop.permute.xlu1 %2560 }
0x2c52   :  { %v2563_v51 = vadd.f32 %v2561_v56, %v2553_v14 }
0x2c54   :  { %3710 = vtanh.f32 %v2563_v51 }
0x2c5e   :  { %v3711_v57 = vpop.eup %3710 }
0x2c5f   :  { %2566 = vrot.lane.b32.xlu1 %v3711_v57, %s3801_s13 }
0x2cd1   :  { %v2567_v54 = vpop.permute.xlu1 %2566 }
0x2cd2   :  { %v2569_v58 = vmul.f32 %v2567_v54, %v2551_v52 }
0x2cd4   :  { %2571 = vrot.lane.b32.xlu1 %v2569_v58, %s3803_s14 }
0x2cd8   :  { %2575 = vrot.lane.b32.xlu1 %v2458_v29, %s3805_s16 }
0x2d46   :  { %v2572_v59 = vpop.permute.xlu1 %2571 }
0x2d4a   :  { %v2576_v61 = vpop.permute.xlu1 %2575 }
0x2d4b   :  { %v2578_v62 = vsel %vm90_vm1, %v2572_v59, %v2576_v61 }
0x2d4c   :  { %3317 = vmatmul.mubr.msk.f32.vlgmr.msra.gmra.mrb[22].mxu0 %vm205_vm2, %v2578_v62 }
0x2e1f   :  { %v2648_v63 = vpop.f32.mrb[22].mxu0 }
0x2e20   :  { %v2649_v4 = vadd.f32 %v4340_v21, %v2648_v63  ;;  %v3318_v12 = vpop.f32.mrb[23].mxu0 }
0x2e22   :  { %3712 = vtanh.f32 %v2649_v4  ;;  %v2652_v0 = vmul.f32 0.5, %v2649_v4 }
0x2e24   :  { %3714 = vtanh.f32 %v2652_v0 }
0x2e2c   :  { %v3713_v13 = vpop.eup %3712 }
0x2e2d   :  { %2659 = vrot.lane.b32.xlu0 %v3713_v13, %s3801_s13 }
0x2e2e   :  { %v3715_v6 = vpop.eup %3714 }
0x2e2f   :  { %v2654_v5 = vmul.f32 0.5, %v3715_v6 }
0x2e31   :  { %532 = vrot.lane.b32.xlu0 %v530_v16, %s3803_s14  ;;  %v2655_v32 = vadd.f32 0.5, %v2654_v5 }
0x2e33   :  { %v2657_v15 = vmul.f32 %v2655_v32, %v4428_v26 }
0x2e9f   :  { %v2660_v17 = vpop.permute.xlu0 %2659 }
0x2ea0   :  { %v2662_v2 = vmul.f32 %v2660_v17, %v2655_v32 }
0x2ea2   :  { %2664 = vrot.lane.b32.xlu1 %v2662_v2, %s3801_s13 }
0x2ea3   :  { %v533_v21 = vpop.permute.xlu0 %532 }
0x2ea4   :  { %v535_v18 = vsel %vm314_vm3, %v533_v21, 0.0 }
0x2ea5   :  { %536 = vadd.xlane.f32.xlu0 %v535_v18 }
0x2ea6   :  { %311 = vrot.lane.b32.xlu1 %v309_v19, %s3803_s14 }
0x2f14   :  { %v2665_v7 = vpop.permute.xlu1 %2664 }
0x2f15   :  { %v2667_v20 = vadd.f32 %v2665_v7, %v2657_v15 }
0x2f17   :  { %3716 = vtanh.f32 %v2667_v20 }
0x2f18   :  { %v312_v34 = vpop.permute.xlu1 %311 }
0x2f19   :  { %v315_v22 = vsel %vm314_vm3, %v312_v34, 0.0 }
0x2f1a   :  { %316 = vadd.xlane.f32.xlu1 %v315_v22 }
0x2f21   :  { %v3717_v23 = vpop.eup %3716 }
0x2f22   :  { %2670 = vrot.lane.b32.xlu0 %v3717_v23, %s3801_s13 }
0x2f26   :  { %960 = vrot.lane.b32.xlu0 %v958_v37, %s3803_s14 }
0x2f2b   :  { %746 = vrot.lane.b32.xlu1 %v744_v25, %s3803_s14 }
0x2f32   :  { %v537_v24 = vpop.xlane.xlu0 %536 }
0x2f33   :  { %v538_v43 = vadd.f32 %v4291_v46, %v537_v24 }
0x2f94   :  { %v2671_v1 = vpop.permute.xlu0 %2670 }
0x2f95   :  { %v2673_v30 = vmul.f32 %v2671_v1, %v2655_v32 }
0x2f97   :  { %v2674_v3 = vmul.f32 %v2673_v30, %v4286_v42 }
0x2f98   :  { %v961_v41 = vpop.permute.xlu0 %960 }
0x2f99   :  { %v963_v26 = vsel %vm314_vm3, %v961_v41, 0.0 }
0x2f9a   :  { %964 = vadd.xlane.f32.xlu0 %v963_v26 }
0x2fa7   :  { %v4469_v10 = vpop.xlane.xlu1 %316 }
0x2fa8   :  { %v324_v59 = vadd.f32 %v4291_v46, %v4469_v10 }
0x2fab   :  { %v747_v27 = vpop.permute.xlu1 %746 }
0x2fac   :  { %v749_v29 = vsel %vm314_vm3, %v747_v27, 0.0 }
0x2fad   :  { %750 = vadd.xlane.f32.xlu1 %v749_v29 }
0x2fb0   :  { %1388 = vrot.lane.b32.xlu0 %v1386_v50, %s3803_s14 }
0x2fbe   :  { %1174 = vrot.lane.b32.xlu1 %v1172_v60, %s3803_s14 }
0x2fc2   :  { %1602 = vrot.lane.b32.xlu1 %v1600_v31, %s3803_s14 }
0x2fc6   :  { %2676 = vrot.lane.b32.xlu1 %v2674_v3, %s3803_s14 }
0x3027   :  { %v965_v49 = vpop.xlane.xlu0 %964 }
0x3028   :  { %v966_v48 = vadd.f32 %v4291_v46, %v965_v49 }
0x302b   :  { %v1389_v36 = vpop.permute.xlu0 %1388 }
0x302c   :  { %v1391_v28 = vsel %vm314_vm3, %v1389_v36, 0.0 }
0x302d   :  { %1392 = vadd.xlane.f32.xlu0 %v1391_v28 }
0x303a   :  { %v751_v38 = vpop.xlane.xlu1 %750 }
0x303b   :  { %v752_v47 = vadd.f32 %v4291_v46, %v751_v38 }
0x303e   :  { %v1175_v40 = vpop.permute.xlu1 %1174 }
0x303f   :  { %v1177_v39 = vsel %vm314_vm3, %v1175_v40, 0.0 }
0x3040   :  { %1178 = vadd.xlane.f32.xlu1 %v1177_v39 }
0x3042   :  { %v1603_v44 = vpop.permute.xlu1 %1602 }
0x3043   :  { %v1605_v8 = vsel %vm314_vm3, %v1603_v44, 0.0  ;;  %2684 = vrot.lane.b32.xlu0 %v538_v43, %s3811_s5 }
0x3044   :  { %1606 = vadd.xlane.f32.xlu1 %v1605_v8 }
0x3046   :  { %v2677_v42 = vpop.permute.xlu1 %2676 }
0x3047   :  { %v2679_v45 = vsel %vm314_vm3, %v2677_v42, 0.0 }
0x3048   :  { %2680 = vadd.xlane.f32.xlu1 %v2679_v45 }
0x3059   :  { %2688 = vrot.lane.b32.xlu1 %v752_v47, %s3812_s23 }
0x305d   :  { %2692 = vrot.lane.b32.xlu1 %v966_v48, %s3813_s24 }
0x30ba   :  { %v1393_v52 = vpop.xlane.xlu0 %1392 }
0x30bb   :  { %v1394_v53 = vadd.f32 %v4291_v46, %v1393_v52 }
0x30bd   :  { %2700 = vrot.lane.b32.xlu1 %v1394_v53, %s3814_s25 }
0x30be   :  { %v2685_v58 = vpop.permute.xlu0 %2684 }
0x30bf   :  { %v2724_v62 = vsel %vm2723_vm4, %v324_v59, %v2685_v58 }
0x30c1   :  { %2707 = vrot.lane.b32.xlu1 %v4294_v11, %s3815_s26 }
0x30c5   :  { %2713 = vrot.lane.b32.xlu1 %v4398_v33, %s3816_s27 }
0x30cd   :  { %v1179_v55 = vpop.xlane.xlu1 %1178 }
0x30ce   :  { %v1180_v14 = vadd.f32 %v4291_v46, %v1179_v55 }
0x30d0   :  { %2696 = vrot.lane.b32.xlu0 %v1180_v14, %s3817_s28 }
0x30d1   :  { %v1607_v56 = vpop.xlane.xlu1 %1606 }
0x30d2   :  { %v1608_v51 = vadd.f32 %v4291_v46, %v1607_v56 }
0x30d4   :  { %2704 = vrot.lane.b32.xlu0 %v1608_v51, %s3818_s29 }
0x30d5   :  { %v2681_v57 = vpop.xlane.xlu1 %2680 }
0x30d6   :  { %v2682_v54 = vadd.f32 %v4291_v46, %v2681_v57 }
0x30d8   :  { %2710 = vrot.lane.b32.xlu0 %v4354_v35, %s3795_s17  ;;  %2720 = vrot.lane.b32.xlu1 %v2682_v54, %s3819_s2  ;;  %s3821_s17 = smov [#allocation8]  }
0x30d9   :  { %v2689_v11 = vpop.permute.xlu1 %2688  ;;  %s2753_s4 = sshll.u32 %s3821_s17, 4  ;;  %s2754_s4 = int_to_ptr.vmem [resolvable:$true] %s2753_s4 }
0x30da   :  { %v2726_v63 = vsel %vm2725_vm5, %v2724_v62, %v2689_v11  ;;  %s3765_s9 = scalar_lea.vmem %s2754_s4, 32  ;;  %p3770_p3 = scmp.lt.s32.totalorder %s2754_s4, %s2754_s4 }
0x30db   :  { %p3766_p2 = scmp.ne.s32.totalorder %s2754_s4, %s3765_s9  ;;  %p3771_p4 = scmp.lt.s32.totalorder %s3765_s9, %s3765_s9 }
0x30dc   :  { %2716 = vrot.lane.b32.xlu0 %v4436_v9, %s3820_s30 }
0x30dd   :  { %v2693_v33 = vpop.permute.xlu1 %2692  ;;  %p3772_p5 = por %p3771_p4, %p3770_p3 }
0x30de   :  { %v2728_v4 = vsel %vm2727_vm6, %v2726_v63, %v2693_v33 }
0x30df   :  { %p3773_p6 = pnand %p3772_p5, %p3766_p2 }
0x312f   :  { %v2701_v61 = vpop.permute.xlu1 %2700 }
0x3133   :  { %v2708_v13 = vpop.permute.xlu1 %2707 }
0x3137   :  { %v2714_v46 = vpop.permute.xlu1 %2713 }
0x3142   :  { %v2697_v35 = vpop.permute.xlu0 %2696 }
0x3143   :  { %v2730_v12 = vsel %vm2729_vm7, %v2728_v4, %v2697_v35 }
0x3144   :  { %v2732_v9 = vsel %vm2731_vm8, %v2730_v12, %v2701_v61 }
0x3146   :  { %v2705_v16 = vpop.permute.xlu0 %2704 }
0x3147   :  { %v2734_v0 = vsel %vm2733_vm9, %v2732_v9, %v2705_v16 }
0x3148   :  { %v2736_v6 = vsel %vm2735_vm10, %v2734_v0, %v2708_v13 }
0x314a   :  { %v2711_v5 = vpop.permute.xlu0 %2710  ;;  %v2721_v21 = vpop.permute.xlu1 %2720 }
0x314b   :  { %v2738_v32 = vsel %vm2737_vm11, %v2736_v6, %v2711_v5 }
0x314c   :  { %v2740_v17 = vsel %vm2739_vm12, %v2738_v32, %v2714_v46 }
0x314e   :  { %v2717_v2 = vpop.permute.xlu0 %2716 }
0x314f   :  { %v2742_v18 = vsel %vm2741_vm13, %v2740_v17, %v2717_v2 }
0x3150   :  { %v2744_v19 = vsel %vm2743_vm14, %v2742_v18, %v2721_v21 }
0x3151   :  { %2746 = vst.msk [vmem:[#allocation8] sm:$0x3] %vm2745_vm15, %v2744_v19 }
0x3152   :  { %3776 = shalt.err (!%p3773_p6)
}
0x3153   :  { %s3777_s11 = scalar_lea.hbm %s4521_s8, 32 }
0x3154   :  { %p3778_p7 = scmp.ne.s32.totalorder %s4521_s8, %s3777_s11  ;;  %p3781_p8 = scmp.lt.u32.totalorder %s3777_s11, %s4521_s8 }
0x3156   :  { %p3783_p9 = pnand %p3781_p8, %p3778_p7 }
0x3158   :  { %3786 = shalt.err (!%p3783_p9)
}
0x3159   :  { %2756 = dma.vmem_to_hbm [thread:$0]  %s2754_s4, 32, %s4521_s8, [#allocation5]  }
0x315a   :  { %3791 = dma.done.wait [#allocation5], 32  }
0x315b   :  { %3792 = vsyncadd [#allocation5], 4294967264 }
0x315c   :  { %2760 = vsyncpa [#allocation4], 1 }
0x315d   :  { %2761 = vsyncpa [#allocation7], 1 }
0x315e   :  { %2762 = vsyncpa [#allocation5], 1 }

</bundles_post_ra>
